<compile_context>
chip_gen: v7x
topology: tpu7x:2x2x1
jax: 0.10.0
libtpu: 0.0.40
codegen_flags: <defaults>
</compile_context>

<pallas_src>
import functools
import math

import jax
import jax.numpy as jnp
from jax.experimental import pallas as pl
from jax.experimental.pallas import tpu as pltpu  # noqa: F401  (TPU backend assumed)

# ---------------- synthetic XLM-R-like config (small) ----------------
VOCAB = 100
HIDDEN = 32
N_LAYERS = 2
N_HEADS = 4
HEAD_DIM = HIDDEN // N_HEADS
INTERMEDIATE = 64
MAX_POS = 16
PAD_ID = 1          # RoBERTa pad token id
LN_EPS = 1e-5

NER_LABEL_IDS = {'O': 0, 'B-PER': 1, 'I-PER': 2, 'B-ORG': 3, 'I-ORG': 4,
                 'B-LOC': 5, 'I-LOC': 6, 'B-TIME': 7, 'I-TIME': 8,
                 'B-O': 0, 'I-O': 0}
NUM_LABELS_NER = len(NER_LABEL_IDS)                 # 11
SENTIMENT_LABEL_IDS = {'neutral': 0, 'positive': 1, 'negative': 2}
NUM_LABELS_SENTIMENT = len(SENTIMENT_LABEL_IDS)     # 3


# ---------------- fused encoder kernel ----------------
def _ln(x, g, b, eps=LN_EPS):
    """Row-wise LayerNorm; g, b are [1, H] and broadcast over rows."""
    mean = jnp.mean(x, axis=-1, keepdims=True)
    cent = x - mean
    var = jnp.mean(cent * cent, axis=-1, keepdims=True)
    return cent * jax.lax.rsqrt(var + eps) * g + b


def _encoder_kernel(emb_ref, mask_ref,
                    emb_ln_g_ref, emb_ln_b_ref,
                    qkv_w_ref, qkv_b_ref, ao_w_ref, ao_b_ref,
                    ln1_g_ref, ln1_b_ref, fi_w_ref, fi_b_ref,
                    fo_w_ref, fo_b_ref, ln2_g_ref, ln2_b_ref,
                    out_ref, *, batch, seq):
    H, nh, d = HIDDEN, N_HEADS, HEAD_DIM

    # embeddings LayerNorm (nn.Dropout(0.1) is identity at inference time)
    x = _ln(emb_ref[...].astype(jnp.float32), emb_ln_g_ref[...], emb_ln_b_ref[...])

    # additive key-padding bias built in-kernel from the [B, S] mask
    neg = (1.0 - mask_ref[...]) * -1e9                      # [B, S]

    for l in range(N_LAYERS):                               # static unroll; weights resident
        # ---- fused QKV projection (Q already pre-scaled by 1/sqrt(d)) ----
        qkv = jnp.dot(x, qkv_w_ref[l],
                      preferred_element_type=jnp.float32) + qkv_b_ref[l]    # [M, 3H]
        q, k, v = qkv[:, 0:H], qkv[:, H:2 * H], qkv[:, 2 * H:3 * H]

        ao_w = ao_w_ref[l]                                  # [H, H]
        rows = []
        for b in range(batch):                              # static unroll over batch
            bias_b = neg[b:b + 1, :]                        # [1, S] -> broadcasts over queries
            attn_b = jnp.zeros((seq, H), jnp.float32)
            for h in range(nh):                             # static unroll over heads
                r0, c0 = b * seq, h * d
                q_bh = q[r0:r0 + seq, c0:c0 + d]            # [S, d]
                k_bh = k[r0:r0 + seq, c0:c0 + d]
                v_bh = v[r0:r0 + seq, c0:c0 + d]
                s = jax.lax.dot_general(q_bh, k_bh, (((1,), (1,)), ((), ())),
                                        preferred_element_type=jnp.float32)  # [S, S]
                s = s + bias_b
                m = jnp.max(s, axis=-1, keepdims=True)
                p = jnp.exp(s - m)
                p = p * pl.reciprocal(jnp.sum(p, axis=-1, keepdims=True), approx=True)
                ctx = jnp.dot(p, v_bh, preferred_element_type=jnp.float32)   # [S, d]
                # fold this head's slice of the output projection (== concat(ctx_h) @ W_o)
                attn_b = attn_b + jnp.dot(ctx, ao_w[c0:c0 + d, :],
                                          preferred_element_type=jnp.float32)
            rows.append(attn_b)
        attn_out = jnp.concatenate(rows, axis=0) + ao_b_ref[l]               # [B*S, H]

        # residual + LayerNorm fused as epilogue
        x = _ln(x + attn_out, ln1_g_ref[l], ln1_b_ref[l])

        # ---- FFN with residual + LayerNorm fused ----
        h1 = jnp.dot(x, fi_w_ref[l], preferred_element_type=jnp.float32) + fi_b_ref[l]
        # TODO(synk): HF XLM-R uses exact (erf) GELU; tanh approximation used here
        # because it lowers cleanly to the TPU EUP.
        h1 = jax.nn.gelu(h1, approximate=True)
        h2 = jnp.dot(h1, fo_w_ref[l], preferred_element_type=jnp.float32) + fo_b_ref[l]
        x = _ln(x + h2, ln2_g_ref[l], ln2_b_ref[l])

    out_ref[...] = x.astype(out_ref.dtype)


def xlmr_encoder(emb_flat, attn_mask_f32, enc):
    """One pallas_call for embedding-LN + all encoder layers.  Full arrays in VMEM."""
    M, H = emb_flat.shape
    B, S = attn_mask_f32.shape
    return pl.pallas_call(
        functools.partial(_encoder_kernel, batch=B, seq=S),
        out_shape=jax.ShapeDtypeStruct((M, H), jnp.float32),
    )(emb_flat, attn_mask_f32,
      enc["emb_ln_g"], enc["emb_ln_b"],
      enc["qkv_w"], enc["qkv_b"], enc["ao_w"], enc["ao_b"],
      enc["ln1_g"], enc["ln1_b"], enc["fi_w"], enc["fi_b"],
      enc["fo_w"], enc["fo_b"], enc["ln2_g"], enc["ln2_b"])


# ---------------- model (embeddings + heads in XLA, encoder in Pallas) ----------------
def multitask_forward(params, input_ids, attention_mask, task_name):
    B, S = input_ids.shape
    H = HIDDEN

    # --- embeddings (token gather has no clean Pallas equivalent; done in XLA) ---
    # RoBERTa-style position ids derived from the pad mask (max id = S+PAD_ID < MAX_POS here).
    tok_mask = (input_ids != PAD_ID).astype(jnp.int32)
    position_ids = jnp.cumsum(tok_mask, axis=1) * tok_mask + PAD_ID
    emb = (params["word_emb"][input_ids]
           + params["pos_emb"][position_ids]
           + params["type_emb"][0][None, None, :])

    # --- fused encoder: emb LN + N_LAYERS transformer layers in ONE kernel ---
    seq_flat = xlmr_encoder(emb.reshape(B * S, H),
                            attention_mask.astype(jnp.float32),
                            params["enc"])
    sequence_output = seq_flat.reshape(B, S, H)         # outputs[0]; dropout = identity (eval)

    # --- tiny heads in plain XLA (per perf feedback: avoid lane-sparse pallas_calls) ---
    if task_name == "ner":
        return sequence_output @ params["ner_w"] + params["ner_b"]
    elif task_name == "sentiment":
        # RoBERTa pooler: dense + tanh on the [CLS] (first) token -> outputs[1]
        pooled = jnp.tanh(sequence_output[:, 0, :] @ params["pool_w"] + params["pool_b"])
        return pooled @ params["sent_w"] + params["sent_b"]
    else:
        raise ValueError(f"Invalid task name: {task_name}")


# ---------------- synthetic parameters (pre-fused / stacked layout) ----------------
def init_params(key):
    keys = iter(jax.random.split(key, 64))

    def w(shape):
        return 0.02 * jax.random.normal(next(keys), shape, dtype=jnp.float32)

    def zeros(shape):
        return jnp.zeros(shape, jnp.float32)

    def ones(shape):
        return jnp.ones(shape, jnp.float32)

    H, I, L = HIDDEN, INTERMEDIATE, N_LAYERS
    scale = 1.0 / math.sqrt(HEAD_DIM)   # folded into Q projection (== scores / sqrt(d))

    qkv_w, qkv_b, ao_w, ao_b = [], [], [], []
    ln1_g, ln1_b, fi_w, fi_b, fo_w, fo_b, ln2_g, ln2_b = [], [], [], [], [], [], [], []
    for _ in range(L):
        qw, kw, vw = w((H, H)), w((H, H)), w((H, H))
        qb, kb, vb = w((H,)), w((H,)), w((H,))
        qkv_w.append(jnp.concatenate([qw * scale, kw, vw], axis=1))          # [H, 3H]
        qkv_b.append(jnp.concatenate([qb * scale, kb, vb]).reshape(1, 3 * H))
        ao_w.append(w((H, H)));       ao_b.append(w((H,)).reshape(1, H))
        ln1_g.append(ones((1, H)));   ln1_b.append(zeros((1, H)))
        fi_w.append(w((H, I)));       fi_b.append(w((I,)).reshape(1, I))
        fo_w.append(w((I, H)));       fo_b.append(w((H,)).reshape(1, H))
        ln2_g.append(ones((1, H)));   ln2_b.append(zeros((1, H)))

    enc = {
        "emb_ln_g": ones((1, H)), "emb_ln_b": zeros((1, H)),
        "qkv_w": jnp.stack(qkv_w), "qkv_b": jnp.stack(qkv_b),
        "ao_w": jnp.stack(ao_w), "ao_b": jnp.stack(ao_b),
        "ln1_g": jnp.stack(ln1_g), "ln1_b": jnp.stack(ln1_b),
        "fi_w": jnp.stack(fi_w), "fi_b": jnp.stack(fi_b),
        "fo_w": jnp.stack(fo_w), "fo_b": jnp.stack(fo_b),
        "ln2_g": jnp.stack(ln2_g), "ln2_b": jnp.stack(ln2_b),
    }
    return {
        "word_emb": w((VOCAB, H)),
        "pos_emb": w((MAX_POS, H)),
        "type_emb": w((1, H)),
        "enc": enc,
        "pool_w": w((H, H)), "pool_b": w((H,)),
        "ner_w": w((H, NUM_LABELS_NER)), "ner_b": w((NUM_LABELS_NER,)),
        "sent_w": w((H, NUM_LABELS_SENTIMENT)), "sent_b": w((NUM_LABELS_SENTIMENT,)),
    }


if __name__ == "__main__":
    B, S = 2, 8
    key = jax.random.PRNGKey(0)
    k_ids, _ = jax.random.split(key)
    input_ids = jax.random.randint(k_ids, (B, S), 2, VOCAB, dtype=jnp.int32)
    attention_mask = jnp.ones((B, S), dtype=jnp.int32)
    attention_mask = attention_mask.at[1, 6:].set(0)          # pad tail of 2nd seq
    input_ids = jnp.where(attention_mask == 1, input_ids, PAD_ID)

    params = init_params(jax.random.PRNGKey(42))

    ner_logits = multitask_forward(params, input_ids, attention_mask, "ner")
    sent_logits = multitask_forward(params, input_ids, attention_mask, "sentiment")
    jax.block_until_ready((ner_logits, sent_logits))

    assert ner_logits.shape == (B, S, NUM_LABELS_NER)
    assert sent_logits.shape == (B, NUM_LABELS_SENTIMENT)
    assert bool(jnp.all(jnp.isfinite(ner_logits))) and bool(jnp.all(jnp.isfinite(sent_logits)))
    print("KERNEL_OK")
</pallas_src>

<mosaic_0001>
module attributes {stable_mosaic.version = 11 : i64} {
  func.func @_encoder_kernel(%arg0: memref<16x32xf32, #tpu.memory_space<vmem>>, %arg1: memref<2x8xf32, #tpu.memory_space<vmem>>, %arg2: memref<1x32xf32, #tpu.memory_space<vmem>>, %arg3: memref<1x32xf32, #tpu.memory_space<vmem>>, %arg4: memref<2x32x96xf32, #tpu.memory_space<vmem>>, %arg5: memref<2x1x96xf32, #tpu.memory_space<vmem>>, %arg6: memref<2x32x32xf32, #tpu.memory_space<vmem>>, %arg7: memref<2x1x32xf32, #tpu.memory_space<vmem>>, %arg8: memref<2x1x32xf32, #tpu.memory_space<vmem>>, %arg9: memref<2x1x32xf32, #tpu.memory_space<vmem>>, %arg10: memref<2x32x64xf32, #tpu.memory_space<vmem>>, %arg11: memref<2x1x64xf32, #tpu.memory_space<vmem>>, %arg12: memref<2x64x32xf32, #tpu.memory_space<vmem>>, %arg13: memref<2x1x32xf32, #tpu.memory_space<vmem>>, %arg14: memref<2x1x32xf32, #tpu.memory_space<vmem>>, %arg15: memref<2x1x32xf32, #tpu.memory_space<vmem>>, %arg16: memref<16x32xf32, #tpu.memory_space<vmem>>) attributes {dimension_semantics = [], scalar_prefetch = 0 : i64, scratch_operands = 0 : i64, tpu.core_type = #tpu.core_type<tc>} {
    %c0 = arith.constant 0 : index
    %c0_0 = arith.constant 0 : index
    %0 = vector.load %arg0[%c0, %c0_0] : memref<16x32xf32, #tpu.memory_space<vmem>>, vector<16x32xf32>
    %c0_1 = arith.constant 0 : index
    %c0_2 = arith.constant 0 : index
    %1 = vector.load %arg2[%c0_1, %c0_2] : memref<1x32xf32, #tpu.memory_space<vmem>>, vector<1x32xf32>
    %c0_3 = arith.constant 0 : index
    %c0_4 = arith.constant 0 : index
    %2 = vector.load %arg3[%c0_3, %c0_4] : memref<1x32xf32, #tpu.memory_space<vmem>>, vector<1x32xf32>
    %cst = arith.constant dense<0.000000e+00> : vector<16xf32>
    %3 = vector.multi_reduction <add>, %0, %cst [1] : vector<16x32xf32> to vector<16xf32>
    %4 = vector.shape_cast %3 : vector<16xf32> to vector<16x1xf32>
    %cst_5 = arith.constant 3.200000e+01 : f32
    %5 = vector.broadcast %cst_5 : f32 to vector<16x1xf32>
    %6 = arith.divf %4, %5 : vector<16x1xf32>
    %7 = vector.broadcast %6 : vector<16x1xf32> to vector<16x32xf32>
    %8 = arith.subf %0, %7 : vector<16x32xf32>
    %9 = arith.mulf %8, %8 : vector<16x32xf32>
    %cst_6 = arith.constant dense<0.000000e+00> : vector<16xf32>
    %10 = vector.multi_reduction <add>, %9, %cst_6 [1] : vector<16x32xf32> to vector<16xf32>
    %11 = vector.shape_cast %10 : vector<16xf32> to vector<16x1xf32>
    %cst_7 = arith.constant 3.200000e+01 : f32
    %12 = vector.broadcast %cst_7 : f32 to vector<16x1xf32>
    %13 = arith.divf %11, %12 : vector<16x1xf32>
    %cst_8 = arith.constant 9.99999974E-6 : f32
    %14 = vector.broadcast %cst_8 : f32 to vector<16x1xf32>
    %15 = arith.addf %13, %14 : vector<16x1xf32>
    %16 = math.rsqrt %15 : vector<16x1xf32>
    %17 = vector.broadcast %16 : vector<16x1xf32> to vector<16x32xf32>
    %18 = arith.mulf %8, %17 : vector<16x32xf32>
    %19 = vector.broadcast %1 : vector<1x32xf32> to vector<16x32xf32>
    %20 = arith.mulf %18, %19 : vector<16x32xf32>
    %21 = vector.broadcast %2 : vector<1x32xf32> to vector<16x32xf32>
    %22 = arith.addf %20, %21 : vector<16x32xf32>
    %c0_9 = arith.constant 0 : index
    %c0_10 = arith.constant 0 : index
    %23 = vector.load %arg1[%c0_9, %c0_10] : memref<2x8xf32, #tpu.memory_space<vmem>>, vector<2x8xf32>
    %cst_11 = arith.constant 1.000000e+00 : f32
    %24 = vector.broadcast %cst_11 : f32 to vector<2x8xf32>
    %25 = arith.subf %24, %23 : vector<2x8xf32>
    %cst_12 = arith.constant -1.000000e+09 : f32
    %26 = vector.broadcast %cst_12 : f32 to vector<2x8xf32>
    %27 = arith.mulf %25, %26 : vector<2x8xf32>
    %c0_13 = arith.constant 0 : index
    %c0_14 = arith.constant 0 : index
    %c0_15 = arith.constant 0 : index
    %28 = vector.load %arg4[%c0_13, %c0_14, %c0_15] : memref<2x32x96xf32, #tpu.memory_space<vmem>>, vector<1x32x96xf32>
    %29 = vector.shape_cast %28 : vector<1x32x96xf32> to vector<32x96xf32>
    %cst_16 = arith.constant dense<0.000000e+00> : vector<16x96xf32>
    %30 = tpu.matmul %22, %29, %cst_16 {dimension_numbers = #tpu.dot_dimension_numbers<[1], [0], [0], [1], [0, 0, 1, 1], [], []>} : vector<16x32xf32>, vector<32x96xf32>, vector<16x96xf32> -> vector<16x96xf32>
    %c0_17 = arith.constant 0 : index
    %c0_18 = arith.constant 0 : index
    %c0_19 = arith.constant 0 : index
    %31 = vector.load %arg5[%c0_17, %c0_18, %c0_19] : memref<2x1x96xf32, #tpu.memory_space<vmem>>, vector<1x1x96xf32>
    %32 = vector.shape_cast %31 : vector<1x1x96xf32> to vector<1x96xf32>
    %33 = vector.broadcast %32 : vector<1x96xf32> to vector<16x96xf32>
    %34 = arith.addf %30, %33 : vector<16x96xf32>
    %35 = vector.extract_strided_slice %34 {offsets = [0, 0], sizes = [16, 32], strides = [1, 1]} : vector<16x96xf32> to vector<16x32xf32>
    %36 = vector.extract_strided_slice %34 {offsets = [0, 32], sizes = [16, 32], strides = [1, 1]} : vector<16x96xf32> to vector<16x32xf32>
    %37 = vector.extract_strided_slice %34 {offsets = [0, 64], sizes = [16, 32], strides = [1, 1]} : vector<16x96xf32> to vector<16x32xf32>
    %c0_20 = arith.constant 0 : index
    %c0_21 = arith.constant 0 : index
    %c0_22 = arith.constant 0 : index
    %38 = vector.load %arg6[%c0_20, %c0_21, %c0_22] : memref<2x32x32xf32, #tpu.memory_space<vmem>>, vector<1x32x32xf32>
    %39 = vector.shape_cast %38 : vector<1x32x32xf32> to vector<32x32xf32>
    %40 = vector.extract_strided_slice %27 {offsets = [0, 0], sizes = [1, 8], strides = [1, 1]} : vector<2x8xf32> to vector<1x8xf32>
    %cst_23 = arith.constant 0.000000e+00 : f32
    %41 = vector.broadcast %cst_23 : f32 to vector<8x32xf32>
    %42 = vector.extract_strided_slice %35 {offsets = [0, 0], sizes = [8, 8], strides = [1, 1]} : vector<16x32xf32> to vector<8x8xf32>
    %43 = vector.extract_strided_slice %36 {offsets = [0, 0], sizes = [8, 8], strides = [1, 1]} : vector<16x32xf32> to vector<8x8xf32>
    %44 = vector.extract_strided_slice %37 {offsets = [0, 0], sizes = [8, 8], strides = [1, 1]} : vector<16x32xf32> to vector<8x8xf32>
    %cst_24 = arith.constant dense<0.000000e+00> : vector<8x8xf32>
    %45 = tpu.matmul %42, %43, %cst_24 {dimension_numbers = #tpu.dot_dimension_numbers<[1], [1], [0], [0], [0, 0, 1, 0], [], []>} : vector<8x8xf32>, vector<8x8xf32>, vector<8x8xf32> -> vector<8x8xf32>
    %46 = vector.broadcast %40 : vector<1x8xf32> to vector<8x8xf32>
    %47 = arith.addf %45, %46 : vector<8x8xf32>
    %cst_25 = arith.constant dense<0xFF800000> : vector<8xf32>
    %48 = vector.multi_reduction <maximumf>, %47, %cst_25 [1] : vector<8x8xf32> to vector<8xf32>
    %49 = vector.shape_cast %48 : vector<8xf32> to vector<8x1xf32>
    %50 = vector.broadcast %49 : vector<8x1xf32> to vector<8x8xf32>
    %51 = arith.subf %47, %50 : vector<8x8xf32>
    %52 = math.exp %51 : vector<8x8xf32>
    %cst_26 = arith.constant dense<0.000000e+00> : vector<8xf32>
    %53 = vector.multi_reduction <add>, %52, %cst_26 [1] : vector<8x8xf32> to vector<8xf32>
    %54 = vector.shape_cast %53 : vector<8xf32> to vector<8x1xf32>
    %55 = tpu.reciprocal %54 {approx = true} : vector<8x1xf32> -> vector<8x1xf32>
    %56 = vector.broadcast %55 : vector<8x1xf32> to vector<8x8xf32>
    %57 = arith.mulf %52, %56 : vector<8x8xf32>
    %cst_27 = arith.constant dense<0.000000e+00> : vector<8x8xf32>
    %58 = tpu.matmul %57, %44, %cst_27 {dimension_numbers = #tpu.dot_dimension_numbers<[1], [0], [0], [1], [0, 0, 1, 1], [], []>} : vector<8x8xf32>, vector<8x8xf32>, vector<8x8xf32> -> vector<8x8xf32>
    %59 = vector.extract_strided_slice %39 {offsets = [0, 0], sizes = [8, 32], strides = [1, 1]} : vector<32x32xf32> to vector<8x32xf32>
    %cst_28 = arith.constant dense<0.000000e+00> : vector<8x32xf32>
    %60 = tpu.matmul %58, %59, %cst_28 {dimension_numbers = #tpu.dot_dimension_numbers<[1], [0], [0], [1], [0, 0, 1, 1], [], []>} : vector<8x8xf32>, vector<8x32xf32>, vector<8x32xf32> -> vector<8x32xf32>
    %61 = arith.addf %41, %60 : vector<8x32xf32>
    %62 = vector.extract_strided_slice %35 {offsets = [0, 8], sizes = [8, 8], strides = [1, 1]} : vector<16x32xf32> to vector<8x8xf32>
    %63 = vector.extract_strided_slice %36 {offsets = [0, 8], sizes = [8, 8], strides = [1, 1]} : vector<16x32xf32> to vector<8x8xf32>
    %64 = vector.extract_strided_slice %37 {offsets = [0, 8], sizes = [8, 8], strides = [1, 1]} : vector<16x32xf32> to vector<8x8xf32>
    %cst_29 = arith.constant dense<0.000000e+00> : vector<8x8xf32>
    %65 = tpu.matmul %62, %63, %cst_29 {dimension_numbers = #tpu.dot_dimension_numbers<[1], [1], [0], [0], [0, 0, 1, 0], [], []>} : vector<8x8xf32>, vector<8x8xf32>, vector<8x8xf32> -> vector<8x8xf32>
    %66 = vector.broadcast %40 : vector<1x8xf32> to vector<8x8xf32>
    %67 = arith.addf %65, %66 : vector<8x8xf32>
    %cst_30 = arith.constant dense<0xFF800000> : vector<8xf32>
    %68 = vector.multi_reduction <maximumf>, %67, %cst_30 [1] : vector<8x8xf32> to vector<8xf32>
    %69 = vector.shape_cast %68 : vector<8xf32> to vector<8x1xf32>
    %70 = vector.broadcast %69 : vector<8x1xf32> to vector<8x8xf32>
    %71 = arith.subf %67, %70 : vector<8x8xf32>
    %72 = math.exp %71 : vector<8x8xf32>
    %cst_31 = arith.constant dense<0.000000e+00> : vector<8xf32>
    %73 = vector.multi_reduction <add>, %72, %cst_31 [1] : vector<8x8xf32> to vector<8xf32>
    %74 = vector.shape_cast %73 : vector<8xf32> to vector<8x1xf32>
    %75 = tpu.reciprocal %74 {approx = true} : vector<8x1xf32> -> vector<8x1xf32>
    %76 = vector.broadcast %75 : vector<8x1xf32> to vector<8x8xf32>
    %77 = arith.mulf %72, %76 : vector<8x8xf32>
    %cst_32 = arith.constant dense<0.000000e+00> : vector<8x8xf32>
    %78 = tpu.matmul %77, %64, %cst_32 {dimension_numbers = #tpu.dot_dimension_numbers<[1], [0], [0], [1], [0, 0, 1, 1], [], []>} : vector<8x8xf32>, vector<8x8xf32>, vector<8x8xf32> -> vector<8x8xf32>
    %79 = vector.extract_strided_slice %39 {offsets = [8, 0], sizes = [8, 32], strides = [1, 1]} : vector<32x32xf32> to vector<8x32xf32>
    %cst_33 = arith.constant dense<0.000000e+00> : vector<8x32xf32>
    %80 = tpu.matmul %78, %79, %cst_33 {dimension_numbers = #tpu.dot_dimension_numbers<[1], [0], [0], [1], [0, 0, 1, 1], [], []>} : vector<8x8xf32>, vector<8x32xf32>, vector<8x32xf32> -> vector<8x32xf32>
    %81 = arith.addf %61, %80 : vector<8x32xf32>
    %82 = vector.extract_strided_slice %35 {offsets = [0, 16], sizes = [8, 8], strides = [1, 1]} : vector<16x32xf32> to vector<8x8xf32>
    %83 = vector.extract_strided_slice %36 {offsets = [0, 16], sizes = [8, 8], strides = [1, 1]} : vector<16x32xf32> to vector<8x8xf32>
    %84 = vector.extract_strided_slice %37 {offsets = [0, 16], sizes = [8, 8], strides = [1, 1]} : vector<16x32xf32> to vector<8x8xf32>
    %cst_34 = arith.constant dense<0.000000e+00> : vector<8x8xf32>
    %85 = tpu.matmul %82, %83, %cst_34 {dimension_numbers = #tpu.dot_dimension_numbers<[1], [1], [0], [0], [0, 0, 1, 0], [], []>} : vector<8x8xf32>, vector<8x8xf32>, vector<8x8xf32> -> vector<8x8xf32>
    %86 = vector.broadcast %40 : vector<1x8xf32> to vector<8x8xf32>
    %87 = arith.addf %85, %86 : vector<8x8xf32>
    %cst_35 = arith.constant dense<0xFF800000> : vector<8xf32>
    %88 = vector.multi_reduction <maximumf>, %87, %cst_35 [1] : vector<8x8xf32> to vector<8xf32>
    %89 = vector.shape_cast %88 : vector<8xf32> to vector<8x1xf32>
    %90 = vector.broadcast %89 : vector<8x1xf32> to vector<8x8xf32>
    %91 = arith.subf %87, %90 : vector<8x8xf32>
    %92 = math.exp %91 : vector<8x8xf32>
    %cst_36 = arith.constant dense<0.000000e+00> : vector<8xf32>
    %93 = vector.multi_reduction <add>, %92, %cst_36 [1] : vector<8x8xf32> to vector<8xf32>
    %94 = vector.shape_cast %93 : vector<8xf32> to vector<8x1xf32>
    %95 = tpu.reciprocal %94 {approx = true} : vector<8x1xf32> -> vector<8x1xf32>
    %96 = vector.broadcast %95 : vector<8x1xf32> to vector<8x8xf32>
    %97 = arith.mulf %92, %96 : vector<8x8xf32>
    %cst_37 = arith.constant dense<0.000000e+00> : vector<8x8xf32>
    %98 = tpu.matmul %97, %84, %cst_37 {dimension_numbers = #tpu.dot_dimension_numbers<[1], [0], [0], [1], [0, 0, 1, 1], [], []>} : vector<8x8xf32>, vector<8x8xf32>, vector<8x8xf32> -> vector<8x8xf32>
    %99 = vector.extract_strided_slice %39 {offsets = [16, 0], sizes = [8, 32], strides = [1, 1]} : vector<32x32xf32> to vector<8x32xf32>
    %cst_38 = arith.constant dense<0.000000e+00> : vector<8x32xf32>
    %100 = tpu.matmul %98, %99, %cst_38 {dimension_numbers = #tpu.dot_dimension_numbers<[1], [0], [0], [1], [0, 0, 1, 1], [], []>} : vector<8x8xf32>, vector<8x32xf32>, vector<8x32xf32> -> vector<8x32xf32>
    %101 = arith.addf %81, %100 : vector<8x32xf32>
    %102 = vector.extract_strided_slice %35 {offsets = [0, 24], sizes = [8, 8], strides = [1, 1]} : vector<16x32xf32> to vector<8x8xf32>
    %103 = vector.extract_strided_slice %36 {offsets = [0, 24], sizes = [8, 8], strides = [1, 1]} : vector<16x32xf32> to vector<8x8xf32>
    %104 = vector.extract_strided_slice %37 {offsets = [0, 24], sizes = [8, 8], strides = [1, 1]} : vector<16x32xf32> to vector<8x8xf32>
    %cst_39 = arith.constant dense<0.000000e+00> : vector<8x8xf32>
    %105 = tpu.matmul %102, %103, %cst_39 {dimension_numbers = #tpu.dot_dimension_numbers<[1], [1], [0], [0], [0, 0, 1, 0], [], []>} : vector<8x8xf32>, vector<8x8xf32>, vector<8x8xf32> -> vector<8x8xf32>
    %106 = vector.broadcast %40 : vector<1x8xf32> to vector<8x8xf32>
    %107 = arith.addf %105, %106 : vector<8x8xf32>
    %cst_40 = arith.constant dense<0xFF800000> : vector<8xf32>
    %108 = vector.multi_reduction <maximumf>, %107, %cst_40 [1] : vector<8x8xf32> to vector<8xf32>
    %109 = vector.shape_cast %108 : vector<8xf32> to vector<8x1xf32>
    %110 = vector.broadcast %109 : vector<8x1xf32> to vector<8x8xf32>
    %111 = arith.subf %107, %110 : vector<8x8xf32>
    %112 = math.exp %111 : vector<8x8xf32>
    %cst_41 = arith.constant dense<0.000000e+00> : vector<8xf32>
    %113 = vector.multi_reduction <add>, %112, %cst_41 [1] : vector<8x8xf32> to vector<8xf32>
    %114 = vector.shape_cast %113 : vector<8xf32> to vector<8x1xf32>
    %115 = tpu.reciprocal %114 {approx = true} : vector<8x1xf32> -> vector<8x1xf32>
    %116 = vector.broadcast %115 : vector<8x1xf32> to vector<8x8xf32>
    %117 = arith.mulf %112, %116 : vector<8x8xf32>
    %cst_42 = arith.constant dense<0.000000e+00> : vector<8x8xf32>
    %118 = tpu.matmul %117, %104, %cst_42 {dimension_numbers = #tpu.dot_dimension_numbers<[1], [0], [0], [1], [0, 0, 1, 1], [], []>} : vector<8x8xf32>, vector<8x8xf32>, vector<8x8xf32> -> vector<8x8xf32>
    %119 = vector.extract_strided_slice %39 {offsets = [24, 0], sizes = [8, 32], strides = [1, 1]} : vector<32x32xf32> to vector<8x32xf32>
    %cst_43 = arith.constant dense<0.000000e+00> : vector<8x32xf32>
    %120 = tpu.matmul %118, %119, %cst_43 {dimension_numbers = #tpu.dot_dimension_numbers<[1], [0], [0], [1], [0, 0, 1, 1], [], []>} : vector<8x8xf32>, vector<8x32xf32>, vector<8x32xf32> -> vector<8x32xf32>
    %121 = arith.addf %101, %120 : vector<8x32xf32>
    %122 = vector.extract_strided_slice %27 {offsets = [1, 0], sizes = [1, 8], strides = [1, 1]} : vector<2x8xf32> to vector<1x8xf32>
    %cst_44 = arith.constant 0.000000e+00 : f32
    %123 = vector.broadcast %cst_44 : f32 to vector<8x32xf32>
    %124 = vector.extract_strided_slice %35 {offsets = [8, 0], sizes = [8, 8], strides = [1, 1]} : vector<16x32xf32> to vector<8x8xf32>
    %125 = vector.extract_strided_slice %36 {offsets = [8, 0], sizes = [8, 8], strides = [1, 1]} : vector<16x32xf32> to vector<8x8xf32>
    %126 = vector.extract_strided_slice %37 {offsets = [8, 0], sizes = [8, 8], strides = [1, 1]} : vector<16x32xf32> to vector<8x8xf32>
    %cst_45 = arith.constant dense<0.000000e+00> : vector<8x8xf32>
    %127 = tpu.matmul %124, %125, %cst_45 {dimension_numbers = #tpu.dot_dimension_numbers<[1], [1], [0], [0], [0, 0, 1, 0], [], []>} : vector<8x8xf32>, vector<8x8xf32>, vector<8x8xf32> -> vector<8x8xf32>
    %128 = vector.broadcast %122 : vector<1x8xf32> to vector<8x8xf32>
    %129 = arith.addf %127, %128 : vector<8x8xf32>
    %cst_46 = arith.constant dense<0xFF800000> : vector<8xf32>
    %130 = vector.multi_reduction <maximumf>, %129, %cst_46 [1] : vector<8x8xf32> to vector<8xf32>
    %131 = vector.shape_cast %130 : vector<8xf32> to vector<8x1xf32>
    %132 = vector.broadcast %131 : vector<8x1xf32> to vector<8x8xf32>
    %133 = arith.subf %129, %132 : vector<8x8xf32>
    %134 = math.exp %133 : vector<8x8xf32>
    %cst_47 = arith.constant dense<0.000000e+00> : vector<8xf32>
    %135 = vector.multi_reduction <add>, %134, %cst_47 [1] : vector<8x8xf32> to vector<8xf32>
    %136 = vector.shape_cast %135 : vector<8xf32> to vector<8x1xf32>
    %137 = tpu.reciprocal %136 {approx = true} : vector<8x1xf32> -> vector<8x1xf32>
    %138 = vector.broadcast %137 : vector<8x1xf32> to vector<8x8xf32>
    %139 = arith.mulf %134, %138 : vector<8x8xf32>
    %cst_48 = arith.constant dense<0.000000e+00> : vector<8x8xf32>
    %140 = tpu.matmul %139, %126, %cst_48 {dimension_numbers = #tpu.dot_dimension_numbers<[1], [0], [0], [1], [0, 0, 1, 1], [], []>} : vector<8x8xf32>, vector<8x8xf32>, vector<8x8xf32> -> vector<8x8xf32>
    %141 = vector.extract_strided_slice %39 {offsets = [0, 0], sizes = [8, 32], strides = [1, 1]} : vector<32x32xf32> to vector<8x32xf32>
    %cst_49 = arith.constant dense<0.000000e+00> : vector<8x32xf32>
    %142 = tpu.matmul %140, %141, %cst_49 {dimension_numbers = #tpu.dot_dimension_numbers<[1], [0], [0], [1], [0, 0, 1, 1], [], []>} : vector<8x8xf32>, vector<8x32xf32>, vector<8x32xf32> -> vector<8x32xf32>
    %143 = arith.addf %123, %142 : vector<8x32xf32>
    %144 = vector.extract_strided_slice %35 {offsets = [8, 8], sizes = [8, 8], strides = [1, 1]} : vector<16x32xf32> to vector<8x8xf32>
    %145 = vector.extract_strided_slice %36 {offsets = [8, 8], sizes = [8, 8], strides = [1, 1]} : vector<16x32xf32> to vector<8x8xf32>
    %146 = vector.extract_strided_slice %37 {offsets = [8, 8], sizes = [8, 8], strides = [1, 1]} : vector<16x32xf32> to vector<8x8xf32>
    %cst_50 = arith.constant dense<0.000000e+00> : vector<8x8xf32>
    %147 = tpu.matmul %144, %145, %cst_50 {dimension_numbers = #tpu.dot_dimension_numbers<[1], [1], [0], [0], [0, 0, 1, 0], [], []>} : vector<8x8xf32>, vector<8x8xf32>, vector<8x8xf32> -> vector<8x8xf32>
    %148 = vector.broadcast %122 : vector<1x8xf32> to vector<8x8xf32>
    %149 = arith.addf %147, %148 : vector<8x8xf32>
    %cst_51 = arith.constant dense<0xFF800000> : vector<8xf32>
    %150 = vector.multi_reduction <maximumf>, %149, %cst_51 [1] : vector<8x8xf32> to vector<8xf32>
    %151 = vector.shape_cast %150 : vector<8xf32> to vector<8x1xf32>
    %152 = vector.broadcast %151 : vector<8x1xf32> to vector<8x8xf32>
    %153 = arith.subf %149, %152 : vector<8x8xf32>
    %154 = math.exp %153 : vector<8x8xf32>
    %cst_52 = arith.constant dense<0.000000e+00> : vector<8xf32>
    %155 = vector.multi_reduction <add>, %154, %cst_52 [1] : vector<8x8xf32> to vector<8xf32>
    %156 = vector.shape_cast %155 : vector<8xf32> to vector<8x1xf32>
    %157 = tpu.reciprocal %156 {approx = true} : vector<8x1xf32> -> vector<8x1xf32>
    %158 = vector.broadcast %157 : vector<8x1xf32> to vector<8x8xf32>
    %159 = arith.mulf %154, %158 : vector<8x8xf32>
    %cst_53 = arith.constant dense<0.000000e+00> : vector<8x8xf32>
    %160 = tpu.matmul %159, %146, %cst_53 {dimension_numbers = #tpu.dot_dimension_numbers<[1], [0], [0], [1], [0, 0, 1, 1], [], []>} : vector<8x8xf32>, vector<8x8xf32>, vector<8x8xf32> -> vector<8x8xf32>
    %161 = vector.extract_strided_slice %39 {offsets = [8, 0], sizes = [8, 32], strides = [1, 1]} : vector<32x32xf32> to vector<8x32xf32>
    %cst_54 = arith.constant dense<0.000000e+00> : vector<8x32xf32>
    %162 = tpu.matmul %160, %161, %cst_54 {dimension_numbers = #tpu.dot_dimension_numbers<[1], [0], [0], [1], [0, 0, 1, 1], [], []>} : vector<8x8xf32>, vector<8x32xf32>, vector<8x32xf32> -> vector<8x32xf32>
    %163 = arith.addf %143, %162 : vector<8x32xf32>
    %164 = vector.extract_strided_slice %35 {offsets = [8, 16], sizes = [8, 8], strides = [1, 1]} : vector<16x32xf32> to vector<8x8xf32>
    %165 = vector.extract_strided_slice %36 {offsets = [8, 16], sizes = [8, 8], strides = [1, 1]} : vector<16x32xf32> to vector<8x8xf32>
    %166 = vector.extract_strided_slice %37 {offsets = [8, 16], sizes = [8, 8], strides = [1, 1]} : vector<16x32xf32> to vector<8x8xf32>
    %cst_55 = arith.constant dense<0.000000e+00> : vector<8x8xf32>
    %167 = tpu.matmul %164, %165, %cst_55 {dimension_numbers = #tpu.dot_dimension_numbers<[1], [1], [0], [0], [0, 0, 1, 0], [], []>} : vector<8x8xf32>, vector<8x8xf32>, vector<8x8xf32> -> vector<8x8xf32>
    %168 = vector.broadcast %122 : vector<1x8xf32> to vector<8x8xf32>
    %169 = arith.addf %167, %168 : vector<8x8xf32>
    %cst_56 = arith.constant dense<0xFF800000> : vector<8xf32>
    %170 = vector.multi_reduction <maximumf>, %169, %cst_56 [1] : vector<8x8xf32> to vector<8xf32>
    %171 = vector.shape_cast %170 : vector<8xf32> to vector<8x1xf32>
    %172 = vector.broadcast %171 : vector<8x1xf32> to vector<8x8xf32>
    %173 = arith.subf %169, %172 : vector<8x8xf32>
    %174 = math.exp %173 : vector<8x8xf32>
    %cst_57 = arith.constant dense<0.000000e+00> : vector<8xf32>
    %175 = vector.multi_reduction <add>, %174, %cst_57 [1] : vector<8x8xf32> to vector<8xf32>
    %176 = vector.shape_cast %175 : vector<8xf32> to vector<8x1xf32>
    %177 = tpu.reciprocal %176 {approx = true} : vector<8x1xf32> -> vector<8x1xf32>
    %178 = vector.broadcast %177 : vector<8x1xf32> to vector<8x8xf32>
    %179 = arith.mulf %174, %178 : vector<8x8xf32>
    %cst_58 = arith.constant dense<0.000000e+00> : vector<8x8xf32>
    %180 = tpu.matmul %179, %166, %cst_58 {dimension_numbers = #tpu.dot_dimension_numbers<[1], [0], [0], [1], [0, 0, 1, 1], [], []>} : vector<8x8xf32>, vector<8x8xf32>, vector<8x8xf32> -> vector<8x8xf32>
    %181 = vector.extract_strided_slice %39 {offsets = [16, 0], sizes = [8, 32], strides = [1, 1]} : vector<32x32xf32> to vector<8x32xf32>
    %cst_59 = arith.constant dense<0.000000e+00> : vector<8x32xf32>
    %182 = tpu.matmul %180, %181, %cst_59 {dimension_numbers = #tpu.dot_dimension_numbers<[1], [0], [0], [1], [0, 0, 1, 1], [], []>} : vector<8x8xf32>, vector<8x32xf32>, vector<8x32xf32> -> vector<8x32xf32>
    %183 = arith.addf %163, %182 : vector<8x32xf32>
    %184 = vector.extract_strided_slice %35 {offsets = [8, 24], sizes = [8, 8], strides = [1, 1]} : vector<16x32xf32> to vector<8x8xf32>
    %185 = vector.extract_strided_slice %36 {offsets = [8, 24], sizes = [8, 8], strides = [1, 1]} : vector<16x32xf32> to vector<8x8xf32>
    %186 = vector.extract_strided_slice %37 {offsets = [8, 24], sizes = [8, 8], strides = [1, 1]} : vector<16x32xf32> to vector<8x8xf32>
    %cst_60 = arith.constant dense<0.000000e+00> : vector<8x8xf32>
    %187 = tpu.matmul %184, %185, %cst_60 {dimension_numbers = #tpu.dot_dimension_numbers<[1], [1], [0], [0], [0, 0, 1, 0], [], []>} : vector<8x8xf32>, vector<8x8xf32>, vector<8x8xf32> -> vector<8x8xf32>
    %188 = vector.broadcast %122 : vector<1x8xf32> to vector<8x8xf32>
    %189 = arith.addf %187, %188 : vector<8x8xf32>
    %cst_61 = arith.constant dense<0xFF800000> : vector<8xf32>
    %190 = vector.multi_reduction <maximumf>, %189, %cst_61 [1] : vector<8x8xf32> to vector<8xf32>
    %191 = vector.shape_cast %190 : vector<8xf32> to vector<8x1xf32>
    %192 = vector.broadcast %191 : vector<8x1xf32> to vector<8x8xf32>
    %193 = arith.subf %189, %192 : vector<8x8xf32>
    %194 = math.exp %193 : vector<8x8xf32>
    %cst_62 = arith.constant dense<0.000000e+00> : vector<8xf32>
    %195 = vector.multi_reduction <add>, %194, %cst_62 [1] : vector<8x8xf32> to vector<8xf32>
    %196 = vector.shape_cast %195 : vector<8xf32> to vector<8x1xf32>
    %197 = tpu.reciprocal %196 {approx = true} : vector<8x1xf32> -> vector<8x1xf32>
    %198 = vector.broadcast %197 : vector<8x1xf32> to vector<8x8xf32>
    %199 = arith.mulf %194, %198 : vector<8x8xf32>
    %cst_63 = arith.constant dense<0.000000e+00> : vector<8x8xf32>
    %200 = tpu.matmul %199, %186, %cst_63 {dimension_numbers = #tpu.dot_dimension_numbers<[1], [0], [0], [1], [0, 0, 1, 1], [], []>} : vector<8x8xf32>, vector<8x8xf32>, vector<8x8xf32> -> vector<8x8xf32>
    %201 = vector.extract_strided_slice %39 {offsets = [24, 0], sizes = [8, 32], strides = [1, 1]} : vector<32x32xf32> to vector<8x32xf32>
    %cst_64 = arith.constant dense<0.000000e+00> : vector<8x32xf32>
    %202 = tpu.matmul %200, %201, %cst_64 {dimension_numbers = #tpu.dot_dimension_numbers<[1], [0], [0], [1], [0, 0, 1, 1], [], []>} : vector<8x8xf32>, vector<8x32xf32>, vector<8x32xf32> -> vector<8x32xf32>
    %203 = arith.addf %183, %202 : vector<8x32xf32>
    %204 = tpu.concatenate %121, %203 in 0 : vector<8x32xf32>, vector<8x32xf32> -> vector<16x32xf32>
    %c0_65 = arith.constant 0 : index
    %c0_66 = arith.constant 0 : index
    %c0_67 = arith.constant 0 : index
    %205 = vector.load %arg7[%c0_65, %c0_66, %c0_67] : memref<2x1x32xf32, #tpu.memory_space<vmem>>, vector<1x1x32xf32>
    %206 = vector.shape_cast %205 : vector<1x1x32xf32> to vector<1x32xf32>
    %207 = vector.broadcast %206 : vector<1x32xf32> to vector<16x32xf32>
    %208 = arith.addf %204, %207 : vector<16x32xf32>
    %209 = arith.addf %22, %208 : vector<16x32xf32>
    %c0_68 = arith.constant 0 : index
    %c0_69 = arith.constant 0 : index
    %c0_70 = arith.constant 0 : index
    %210 = vector.load %arg8[%c0_68, %c0_69, %c0_70] : memref<2x1x32xf32, #tpu.memory_space<vmem>>, vector<1x1x32xf32>
    %211 = vector.shape_cast %210 : vector<1x1x32xf32> to vector<1x32xf32>
    %c0_71 = arith.constant 0 : index
    %c0_72 = arith.constant 0 : index
    %c0_73 = arith.constant 0 : index
    %212 = vector.load %arg9[%c0_71, %c0_72, %c0_73] : memref<2x1x32xf32, #tpu.memory_space<vmem>>, vector<1x1x32xf32>
    %213 = vector.shape_cast %212 : vector<1x1x32xf32> to vector<1x32xf32>
    %cst_74 = arith.constant dense<0.000000e+00> : vector<16xf32>
    %214 = vector.multi_reduction <add>, %209, %cst_74 [1] : vector<16x32xf32> to vector<16xf32>
    %215 = vector.shape_cast %214 : vector<16xf32> to vector<16x1xf32>
    %cst_75 = arith.constant 3.200000e+01 : f32
    %216 = vector.broadcast %cst_75 : f32 to vector<16x1xf32>
    %217 = arith.divf %215, %216 : vector<16x1xf32>
    %218 = vector.broadcast %217 : vector<16x1xf32> to vector<16x32xf32>
    %219 = arith.subf %209, %218 : vector<16x32xf32>
    %220 = arith.mulf %219, %219 : vector<16x32xf32>
    %cst_76 = arith.constant dense<0.000000e+00> : vector<16xf32>
    %221 = vector.multi_reduction <add>, %220, %cst_76 [1] : vector<16x32xf32> to vector<16xf32>
    %222 = vector.shape_cast %221 : vector<16xf32> to vector<16x1xf32>
    %cst_77 = arith.constant 3.200000e+01 : f32
    %223 = vector.broadcast %cst_77 : f32 to vector<16x1xf32>
    %224 = arith.divf %222, %223 : vector<16x1xf32>
    %cst_78 = arith.constant 9.99999974E-6 : f32
    %225 = vector.broadcast %cst_78 : f32 to vector<16x1xf32>
    %226 = arith.addf %224, %225 : vector<16x1xf32>
    %227 = math.rsqrt %226 : vector<16x1xf32>
    %228 = vector.broadcast %227 : vector<16x1xf32> to vector<16x32xf32>
    %229 = arith.mulf %219, %228 : vector<16x32xf32>
    %230 = vector.broadcast %211 : vector<1x32xf32> to vector<16x32xf32>
    %231 = arith.mulf %229, %230 : vector<16x32xf32>
    %232 = vector.broadcast %213 : vector<1x32xf32> to vector<16x32xf32>
    %233 = arith.addf %231, %232 : vector<16x32xf32>
    %c0_79 = arith.constant 0 : index
    %c0_80 = arith.constant 0 : index
    %c0_81 = arith.constant 0 : index
    %234 = vector.load %arg10[%c0_79, %c0_80, %c0_81] : memref<2x32x64xf32, #tpu.memory_space<vmem>>, vector<1x32x64xf32>
    %235 = vector.shape_cast %234 : vector<1x32x64xf32> to vector<32x64xf32>
    %cst_82 = arith.constant dense<0.000000e+00> : vector<16x64xf32>
    %236 = tpu.matmul %233, %235, %cst_82 {dimension_numbers = #tpu.dot_dimension_numbers<[1], [0], [0], [1], [0, 0, 1, 1], [], []>} : vector<16x32xf32>, vector<32x64xf32>, vector<16x64xf32> -> vector<16x64xf32>
    %c0_83 = arith.constant 0 : index
    %c0_84 = arith.constant 0 : index
    %c0_85 = arith.constant 0 : index
    %237 = vector.load %arg11[%c0_83, %c0_84, %c0_85] : memref<2x1x64xf32, #tpu.memory_space<vmem>>, vector<1x1x64xf32>
    %238 = vector.shape_cast %237 : vector<1x1x64xf32> to vector<1x64xf32>
    %239 = vector.broadcast %238 : vector<1x64xf32> to vector<16x64xf32>
    %240 = arith.addf %236, %239 : vector<16x64xf32>
    %241 = arith.mulf %240, %240 : vector<16x64xf32>
    %242 = arith.mulf %240, %241 : vector<16x64xf32>
    %cst_86 = arith.constant 4.471500e-02 : f32
    %243 = vector.broadcast %cst_86 : f32 to vector<16x64xf32>
    %244 = arith.mulf %243, %242 : vector<16x64xf32>
    %245 = arith.addf %240, %244 : vector<16x64xf32>
    %cst_87 = arith.constant 0.797884583 : f32
    %246 = vector.broadcast %cst_87 : f32 to vector<16x64xf32>
    %247 = arith.mulf %246, %245 : vector<16x64xf32>
    %248 = math.tanh %247 : vector<16x64xf32>
    %cst_88 = arith.constant 1.000000e+00 : f32
    %249 = vector.broadcast %cst_88 : f32 to vector<16x64xf32>
    %250 = arith.addf %249, %248 : vector<16x64xf32>
    %cst_89 = arith.constant 5.000000e-01 : f32
    %251 = vector.broadcast %cst_89 : f32 to vector<16x64xf32>
    %252 = arith.mulf %251, %250 : vector<16x64xf32>
    %253 = arith.mulf %240, %252 : vector<16x64xf32>
    %c0_90 = arith.constant 0 : index
    %c0_91 = arith.constant 0 : index
    %c0_92 = arith.constant 0 : index
    %254 = vector.load %arg12[%c0_90, %c0_91, %c0_92] : memref<2x64x32xf32, #tpu.memory_space<vmem>>, vector<1x64x32xf32>
    %255 = vector.shape_cast %254 : vector<1x64x32xf32> to vector<64x32xf32>
    %cst_93 = arith.constant dense<0.000000e+00> : vector<16x32xf32>
    %256 = tpu.matmul %253, %255, %cst_93 {dimension_numbers = #tpu.dot_dimension_numbers<[1], [0], [0], [1], [0, 0, 1, 1], [], []>} : vector<16x64xf32>, vector<64x32xf32>, vector<16x32xf32> -> vector<16x32xf32>
    %c0_94 = arith.constant 0 : index
    %c0_95 = arith.constant 0 : index
    %c0_96 = arith.constant 0 : index
    %257 = vector.load %arg13[%c0_94, %c0_95, %c0_96] : memref<2x1x32xf32, #tpu.memory_space<vmem>>, vector<1x1x32xf32>
    %258 = vector.shape_cast %257 : vector<1x1x32xf32> to vector<1x32xf32>
    %259 = vector.broadcast %258 : vector<1x32xf32> to vector<16x32xf32>
    %260 = arith.addf %256, %259 : vector<16x32xf32>
    %261 = arith.addf %233, %260 : vector<16x32xf32>
    %c0_97 = arith.constant 0 : index
    %c0_98 = arith.constant 0 : index
    %c0_99 = arith.constant 0 : index
    %262 = vector.load %arg14[%c0_97, %c0_98, %c0_99] : memref<2x1x32xf32, #tpu.memory_space<vmem>>, vector<1x1x32xf32>
    %263 = vector.shape_cast %262 : vector<1x1x32xf32> to vector<1x32xf32>
    %c0_100 = arith.constant 0 : index
    %c0_101 = arith.constant 0 : index
    %c0_102 = arith.constant 0 : index
    %264 = vector.load %arg15[%c0_100, %c0_101, %c0_102] : memref<2x1x32xf32, #tpu.memory_space<vmem>>, vector<1x1x32xf32>
    %265 = vector.shape_cast %264 : vector<1x1x32xf32> to vector<1x32xf32>
    %cst_103 = arith.constant dense<0.000000e+00> : vector<16xf32>
    %266 = vector.multi_reduction <add>, %261, %cst_103 [1] : vector<16x32xf32> to vector<16xf32>
    %267 = vector.shape_cast %266 : vector<16xf32> to vector<16x1xf32>
    %cst_104 = arith.constant 3.200000e+01 : f32
    %268 = vector.broadcast %cst_104 : f32 to vector<16x1xf32>
    %269 = arith.divf %267, %268 : vector<16x1xf32>
    %270 = vector.broadcast %269 : vector<16x1xf32> to vector<16x32xf32>
    %271 = arith.subf %261, %270 : vector<16x32xf32>
    %272 = arith.mulf %271, %271 : vector<16x32xf32>
    %cst_105 = arith.constant dense<0.000000e+00> : vector<16xf32>
    %273 = vector.multi_reduction <add>, %272, %cst_105 [1] : vector<16x32xf32> to vector<16xf32>
    %274 = vector.shape_cast %273 : vector<16xf32> to vector<16x1xf32>
    %cst_106 = arith.constant 3.200000e+01 : f32
    %275 = vector.broadcast %cst_106 : f32 to vector<16x1xf32>
    %276 = arith.divf %274, %275 : vector<16x1xf32>
    %cst_107 = arith.constant 9.99999974E-6 : f32
    %277 = vector.broadcast %cst_107 : f32 to vector<16x1xf32>
    %278 = arith.addf %276, %277 : vector<16x1xf32>
    %279 = math.rsqrt %278 : vector<16x1xf32>
    %280 = vector.broadcast %279 : vector<16x1xf32> to vector<16x32xf32>
    %281 = arith.mulf %271, %280 : vector<16x32xf32>
    %282 = vector.broadcast %263 : vector<1x32xf32> to vector<16x32xf32>
    %283 = arith.mulf %281, %282 : vector<16x32xf32>
    %284 = vector.broadcast %265 : vector<1x32xf32> to vector<16x32xf32>
    %285 = arith.addf %283, %284 : vector<16x32xf32>
    %c1 = arith.constant 1 : index
    %c0_108 = arith.constant 0 : index
    %c0_109 = arith.constant 0 : index
    %286 = vector.load %arg4[%c1, %c0_108, %c0_109] : memref<2x32x96xf32, #tpu.memory_space<vmem>>, vector<1x32x96xf32>
    %287 = vector.shape_cast %286 : vector<1x32x96xf32> to vector<32x96xf32>
    %cst_110 = arith.constant dense<0.000000e+00> : vector<16x96xf32>
    %288 = tpu.matmul %285, %287, %cst_110 {dimension_numbers = #tpu.dot_dimension_numbers<[1], [0], [0], [1], [0, 0, 1, 1], [], []>} : vector<16x32xf32>, vector<32x96xf32>, vector<16x96xf32> -> vector<16x96xf32>
    %c1_111 = arith.constant 1 : index
    %c0_112 = arith.constant 0 : index
    %c0_113 = arith.constant 0 : index
    %289 = vector.load %arg5[%c1_111, %c0_112, %c0_113] : memref<2x1x96xf32, #tpu.memory_space<vmem>>, vector<1x1x96xf32>
    %290 = vector.shape_cast %289 : vector<1x1x96xf32> to vector<1x96xf32>
    %291 = vector.broadcast %290 : vector<1x96xf32> to vector<16x96xf32>
    %292 = arith.addf %288, %291 : vector<16x96xf32>
    %293 = vector.extract_strided_slice %292 {offsets = [0, 0], sizes = [16, 32], strides = [1, 1]} : vector<16x96xf32> to vector<16x32xf32>
    %294 = vector.extract_strided_slice %292 {offsets = [0, 32], sizes = [16, 32], strides = [1, 1]} : vector<16x96xf32> to vector<16x32xf32>
    %295 = vector.extract_strided_slice %292 {offsets = [0, 64], sizes = [16, 32], strides = [1, 1]} : vector<16x96xf32> to vector<16x32xf32>
    %c1_114 = arith.constant 1 : index
    %c0_115 = arith.constant 0 : index
    %c0_116 = arith.constant 0 : index
    %296 = vector.load %arg6[%c1_114, %c0_115, %c0_116] : memref<2x32x32xf32, #tpu.memory_space<vmem>>, vector<1x32x32xf32>
    %297 = vector.shape_cast %296 : vector<1x32x32xf32> to vector<32x32xf32>
    %298 = vector.extract_strided_slice %27 {offsets = [0, 0], sizes = [1, 8], strides = [1, 1]} : vector<2x8xf32> to vector<1x8xf32>
    %cst_117 = arith.constant 0.000000e+00 : f32
    %299 = vector.broadcast %cst_117 : f32 to vector<8x32xf32>
    %300 = vector.extract_strided_slice %293 {offsets = [0, 0], sizes = [8, 8], strides = [1, 1]} : vector<16x32xf32> to vector<8x8xf32>
    %301 = vector.extract_strided_slice %294 {offsets = [0, 0], sizes = [8, 8], strides = [1, 1]} : vector<16x32xf32> to vector<8x8xf32>
    %302 = vector.extract_strided_slice %295 {offsets = [0, 0], sizes = [8, 8], strides = [1, 1]} : vector<16x32xf32> to vector<8x8xf32>
    %cst_118 = arith.constant dense<0.000000e+00> : vector<8x8xf32>
    %303 = tpu.matmul %300, %301, %cst_118 {dimension_numbers = #tpu.dot_dimension_numbers<[1], [1], [0], [0], [0, 0, 1, 0], [], []>} : vector<8x8xf32>, vector<8x8xf32>, vector<8x8xf32> -> vector<8x8xf32>
    %304 = vector.broadcast %298 : vector<1x8xf32> to vector<8x8xf32>
    %305 = arith.addf %303, %304 : vector<8x8xf32>
    %cst_119 = arith.constant dense<0xFF800000> : vector<8xf32>
    %306 = vector.multi_reduction <maximumf>, %305, %cst_119 [1] : vector<8x8xf32> to vector<8xf32>
    %307 = vector.shape_cast %306 : vector<8xf32> to vector<8x1xf32>
    %308 = vector.broadcast %307 : vector<8x1xf32> to vector<8x8xf32>
    %309 = arith.subf %305, %308 : vector<8x8xf32>
    %310 = math.exp %309 : vector<8x8xf32>
    %cst_120 = arith.constant dense<0.000000e+00> : vector<8xf32>
    %311 = vector.multi_reduction <add>, %310, %cst_120 [1] : vector<8x8xf32> to vector<8xf32>
    %312 = vector.shape_cast %311 : vector<8xf32> to vector<8x1xf32>
    %313 = tpu.reciprocal %312 {approx = true} : vector<8x1xf32> -> vector<8x1xf32>
    %314 = vector.broadcast %313 : vector<8x1xf32> to vector<8x8xf32>
    %315 = arith.mulf %310, %314 : vector<8x8xf32>
    %cst_121 = arith.constant dense<0.000000e+00> : vector<8x8xf32>
    %316 = tpu.matmul %315, %302, %cst_121 {dimension_numbers = #tpu.dot_dimension_numbers<[1], [0], [0], [1], [0, 0, 1, 1], [], []>} : vector<8x8xf32>, vector<8x8xf32>, vector<8x8xf32> -> vector<8x8xf32>
    %317 = vector.extract_strided_slice %297 {offsets = [0, 0], sizes = [8, 32], strides = [1, 1]} : vector<32x32xf32> to vector<8x32xf32>
    %cst_122 = arith.constant dense<0.000000e+00> : vector<8x32xf32>
    %318 = tpu.matmul %316, %317, %cst_122 {dimension_numbers = #tpu.dot_dimension_numbers<[1], [0], [0], [1], [0, 0, 1, 1], [], []>} : vector<8x8xf32>, vector<8x32xf32>, vector<8x32xf32> -> vector<8x32xf32>
    %319 = arith.addf %299, %318 : vector<8x32xf32>
    %320 = vector.extract_strided_slice %293 {offsets = [0, 8], sizes = [8, 8], strides = [1, 1]} : vector<16x32xf32> to vector<8x8xf32>
    %321 = vector.extract_strided_slice %294 {offsets = [0, 8], sizes = [8, 8], strides = [1, 1]} : vector<16x32xf32> to vector<8x8xf32>
    %322 = vector.extract_strided_slice %295 {offsets = [0, 8], sizes = [8, 8], strides = [1, 1]} : vector<16x32xf32> to vector<8x8xf32>
    %cst_123 = arith.constant dense<0.000000e+00> : vector<8x8xf32>
    %323 = tpu.matmul %320, %321, %cst_123 {dimension_numbers = #tpu.dot_dimension_numbers<[1], [1], [0], [0], [0, 0, 1, 0], [], []>} : vector<8x8xf32>, vector<8x8xf32>, vector<8x8xf32> -> vector<8x8xf32>
    %324 = vector.broadcast %298 : vector<1x8xf32> to vector<8x8xf32>
    %325 = arith.addf %323, %324 : vector<8x8xf32>
    %cst_124 = arith.constant dense<0xFF800000> : vector<8xf32>
    %326 = vector.multi_reduction <maximumf>, %325, %cst_124 [1] : vector<8x8xf32> to vector<8xf32>
    %327 = vector.shape_cast %326 : vector<8xf32> to vector<8x1xf32>
    %328 = vector.broadcast %327 : vector<8x1xf32> to vector<8x8xf32>
    %329 = arith.subf %325, %328 : vector<8x8xf32>
    %330 = math.exp %329 : vector<8x8xf32>
    %cst_125 = arith.constant dense<0.000000e+00> : vector<8xf32>
    %331 = vector.multi_reduction <add>, %330, %cst_125 [1] : vector<8x8xf32> to vector<8xf32>
    %332 = vector.shape_cast %331 : vector<8xf32> to vector<8x1xf32>
    %333 = tpu.reciprocal %332 {approx = true} : vector<8x1xf32> -> vector<8x1xf32>
    %334 = vector.broadcast %333 : vector<8x1xf32> to vector<8x8xf32>
    %335 = arith.mulf %330, %334 : vector<8x8xf32>
    %cst_126 = arith.constant dense<0.000000e+00> : vector<8x8xf32>
    %336 = tpu.matmul %335, %322, %cst_126 {dimension_numbers = #tpu.dot_dimension_numbers<[1], [0], [0], [1], [0, 0, 1, 1], [], []>} : vector<8x8xf32>, vector<8x8xf32>, vector<8x8xf32> -> vector<8x8xf32>
    %337 = vector.extract_strided_slice %297 {offsets = [8, 0], sizes = [8, 32], strides = [1, 1]} : vector<32x32xf32> to vector<8x32xf32>
    %cst_127 = arith.constant dense<0.000000e+00> : vector<8x32xf32>
    %338 = tpu.matmul %336, %337, %cst_127 {dimension_numbers = #tpu.dot_dimension_numbers<[1], [0], [0], [1], [0, 0, 1, 1], [], []>} : vector<8x8xf32>, vector<8x32xf32>, vector<8x32xf32> -> vector<8x32xf32>
    %339 = arith.addf %319, %338 : vector<8x32xf32>
    %340 = vector.extract_strided_slice %293 {offsets = [0, 16], sizes = [8, 8], strides = [1, 1]} : vector<16x32xf32> to vector<8x8xf32>
    %341 = vector.extract_strided_slice %294 {offsets = [0, 16], sizes = [8, 8], strides = [1, 1]} : vector<16x32xf32> to vector<8x8xf32>
    %342 = vector.extract_strided_slice %295 {offsets = [0, 16], sizes = [8, 8], strides = [1, 1]} : vector<16x32xf32> to vector<8x8xf32>
    %cst_128 = arith.constant dense<0.000000e+00> : vector<8x8xf32>
    %343 = tpu.matmul %340, %341, %cst_128 {dimension_numbers = #tpu.dot_dimension_numbers<[1], [1], [0], [0], [0, 0, 1, 0], [], []>} : vector<8x8xf32>, vector<8x8xf32>, vector<8x8xf32> -> vector<8x8xf32>
    %344 = vector.broadcast %298 : vector<1x8xf32> to vector<8x8xf32>
    %345 = arith.addf %343, %344 : vector<8x8xf32>
    %cst_129 = arith.constant dense<0xFF800000> : vector<8xf32>
    %346 = vector.multi_reduction <maximumf>, %345, %cst_129 [1] : vector<8x8xf32> to vector<8xf32>
    %347 = vector.shape_cast %346 : vector<8xf32> to vector<8x1xf32>
    %348 = vector.broadcast %347 : vector<8x1xf32> to vector<8x8xf32>
    %349 = arith.subf %345, %348 : vector<8x8xf32>
    %350 = math.exp %349 : vector<8x8xf32>
    %cst_130 = arith.constant dense<0.000000e+00> : vector<8xf32>
    %351 = vector.multi_reduction <add>, %350, %cst_130 [1] : vector<8x8xf32> to vector<8xf32>
    %352 = vector.shape_cast %351 : vector<8xf32> to vector<8x1xf32>
    %353 = tpu.reciprocal %352 {approx = true} : vector<8x1xf32> -> vector<8x1xf32>
    %354 = vector.broadcast %353 : vector<8x1xf32> to vector<8x8xf32>
    %355 = arith.mulf %350, %354 : vector<8x8xf32>
    %cst_131 = arith.constant dense<0.000000e+00> : vector<8x8xf32>
    %356 = tpu.matmul %355, %342, %cst_131 {dimension_numbers = #tpu.dot_dimension_numbers<[1], [0], [0], [1], [0, 0, 1, 1], [], []>} : vector<8x8xf32>, vector<8x8xf32>, vector<8x8xf32> -> vector<8x8xf32>
    %357 = vector.extract_strided_slice %297 {offsets = [16, 0], sizes = [8, 32], strides = [1, 1]} : vector<32x32xf32> to vector<8x32xf32>
    %cst_132 = arith.constant dense<0.000000e+00> : vector<8x32xf32>
    %358 = tpu.matmul %356, %357, %cst_132 {dimension_numbers = #tpu.dot_dimension_numbers<[1], [0], [0], [1], [0, 0, 1, 1], [], []>} : vector<8x8xf32>, vector<8x32xf32>, vector<8x32xf32> -> vector<8x32xf32>
    %359 = arith.addf %339, %358 : vector<8x32xf32>
    %360 = vector.extract_strided_slice %293 {offsets = [0, 24], sizes = [8, 8], strides = [1, 1]} : vector<16x32xf32> to vector<8x8xf32>
    %361 = vector.extract_strided_slice %294 {offsets = [0, 24], sizes = [8, 8], strides = [1, 1]} : vector<16x32xf32> to vector<8x8xf32>
    %362 = vector.extract_strided_slice %295 {offsets = [0, 24], sizes = [8, 8], strides = [1, 1]} : vector<16x32xf32> to vector<8x8xf32>
    %cst_133 = arith.constant dense<0.000000e+00> : vector<8x8xf32>
    %363 = tpu.matmul %360, %361, %cst_133 {dimension_numbers = #tpu.dot_dimension_numbers<[1], [1], [0], [0], [0, 0, 1, 0], [], []>} : vector<8x8xf32>, vector<8x8xf32>, vector<8x8xf32> -> vector<8x8xf32>
    %364 = vector.broadcast %298 : vector<1x8xf32> to vector<8x8xf32>
    %365 = arith.addf %363, %364 : vector<8x8xf32>
    %cst_134 = arith.constant dense<0xFF800000> : vector<8xf32>
    %366 = vector.multi_reduction <maximumf>, %365, %cst_134 [1] : vector<8x8xf32> to vector<8xf32>
    %367 = vector.shape_cast %366 : vector<8xf32> to vector<8x1xf32>
    %368 = vector.broadcast %367 : vector<8x1xf32> to vector<8x8xf32>
    %369 = arith.subf %365, %368 : vector<8x8xf32>
    %370 = math.exp %369 : vector<8x8xf32>
    %cst_135 = arith.constant dense<0.000000e+00> : vector<8xf32>
    %371 = vector.multi_reduction <add>, %370, %cst_135 [1] : vector<8x8xf32> to vector<8xf32>
    %372 = vector.shape_cast %371 : vector<8xf32> to vector<8x1xf32>
    %373 = tpu.reciprocal %372 {approx = true} : vector<8x1xf32> -> vector<8x1xf32>
    %374 = vector.broadcast %373 : vector<8x1xf32> to vector<8x8xf32>
    %375 = arith.mulf %370, %374 : vector<8x8xf32>
    %cst_136 = arith.constant dense<0.000000e+00> : vector<8x8xf32>
    %376 = tpu.matmul %375, %362, %cst_136 {dimension_numbers = #tpu.dot_dimension_numbers<[1], [0], [0], [1], [0, 0, 1, 1], [], []>} : vector<8x8xf32>, vector<8x8xf32>, vector<8x8xf32> -> vector<8x8xf32>
    %377 = vector.extract_strided_slice %297 {offsets = [24, 0], sizes = [8, 32], strides = [1, 1]} : vector<32x32xf32> to vector<8x32xf32>
    %cst_137 = arith.constant dense<0.000000e+00> : vector<8x32xf32>
    %378 = tpu.matmul %376, %377, %cst_137 {dimension_numbers = #tpu.dot_dimension_numbers<[1], [0], [0], [1], [0, 0, 1, 1], [], []>} : vector<8x8xf32>, vector<8x32xf32>, vector<8x32xf32> -> vector<8x32xf32>
    %379 = arith.addf %359, %378 : vector<8x32xf32>
    %380 = vector.extract_strided_slice %27 {offsets = [1, 0], sizes = [1, 8], strides = [1, 1]} : vector<2x8xf32> to vector<1x8xf32>
    %cst_138 = arith.constant 0.000000e+00 : f32
    %381 = vector.broadcast %cst_138 : f32 to vector<8x32xf32>
    %382 = vector.extract_strided_slice %293 {offsets = [8, 0], sizes = [8, 8], strides = [1, 1]} : vector<16x32xf32> to vector<8x8xf32>
    %383 = vector.extract_strided_slice %294 {offsets = [8, 0], sizes = [8, 8], strides = [1, 1]} : vector<16x32xf32> to vector<8x8xf32>
    %384 = vector.extract_strided_slice %295 {offsets = [8, 0], sizes = [8, 8], strides = [1, 1]} : vector<16x32xf32> to vector<8x8xf32>
    %cst_139 = arith.constant dense<0.000000e+00> : vector<8x8xf32>
    %385 = tpu.matmul %382, %383, %cst_139 {dimension_numbers = #tpu.dot_dimension_numbers<[1], [1], [0], [0], [0, 0, 1, 0], [], []>} : vector<8x8xf32>, vector<8x8xf32>, vector<8x8xf32> -> vector<8x8xf32>
    %386 = vector.broadcast %380 : vector<1x8xf32> to vector<8x8xf32>
    %387 = arith.addf %385, %386 : vector<8x8xf32>
    %cst_140 = arith.constant dense<0xFF800000> : vector<8xf32>
    %388 = vector.multi_reduction <maximumf>, %387, %cst_140 [1] : vector<8x8xf32> to vector<8xf32>
    %389 = vector.shape_cast %388 : vector<8xf32> to vector<8x1xf32>
    %390 = vector.broadcast %389 : vector<8x1xf32> to vector<8x8xf32>
    %391 = arith.subf %387, %390 : vector<8x8xf32>
    %392 = math.exp %391 : vector<8x8xf32>
    %cst_141 = arith.constant dense<0.000000e+00> : vector<8xf32>
    %393 = vector.multi_reduction <add>, %392, %cst_141 [1] : vector<8x8xf32> to vector<8xf32>
    %394 = vector.shape_cast %393 : vector<8xf32> to vector<8x1xf32>
    %395 = tpu.reciprocal %394 {approx = true} : vector<8x1xf32> -> vector<8x1xf32>
    %396 = vector.broadcast %395 : vector<8x1xf32> to vector<8x8xf32>
    %397 = arith.mulf %392, %396 : vector<8x8xf32>
    %cst_142 = arith.constant dense<0.000000e+00> : vector<8x8xf32>
    %398 = tpu.matmul %397, %384, %cst_142 {dimension_numbers = #tpu.dot_dimension_numbers<[1], [0], [0], [1], [0, 0, 1, 1], [], []>} : vector<8x8xf32>, vector<8x8xf32>, vector<8x8xf32> -> vector<8x8xf32>
    %399 = vector.extract_strided_slice %297 {offsets = [0, 0], sizes = [8, 32], strides = [1, 1]} : vector<32x32xf32> to vector<8x32xf32>
    %cst_143 = arith.constant dense<0.000000e+00> : vector<8x32xf32>
    %400 = tpu.matmul %398, %399, %cst_143 {dimension_numbers = #tpu.dot_dimension_numbers<[1], [0], [0], [1], [0, 0, 1, 1], [], []>} : vector<8x8xf32>, vector<8x32xf32>, vector<8x32xf32> -> vector<8x32xf32>
    %401 = arith.addf %381, %400 : vector<8x32xf32>
    %402 = vector.extract_strided_slice %293 {offsets = [8, 8], sizes = [8, 8], strides = [1, 1]} : vector<16x32xf32> to vector<8x8xf32>
    %403 = vector.extract_strided_slice %294 {offsets = [8, 8], sizes = [8, 8], strides = [1, 1]} : vector<16x32xf32> to vector<8x8xf32>
    %404 = vector.extract_strided_slice %295 {offsets = [8, 8], sizes = [8, 8], strides = [1, 1]} : vector<16x32xf32> to vector<8x8xf32>
    %cst_144 = arith.constant dense<0.000000e+00> : vector<8x8xf32>
    %405 = tpu.matmul %402, %403, %cst_144 {dimension_numbers = #tpu.dot_dimension_numbers<[1], [1], [0], [0], [0, 0, 1, 0], [], []>} : vector<8x8xf32>, vector<8x8xf32>, vector<8x8xf32> -> vector<8x8xf32>
    %406 = vector.broadcast %380 : vector<1x8xf32> to vector<8x8xf32>
    %407 = arith.addf %405, %406 : vector<8x8xf32>
    %cst_145 = arith.constant dense<0xFF800000> : vector<8xf32>
    %408 = vector.multi_reduction <maximumf>, %407, %cst_145 [1] : vector<8x8xf32> to vector<8xf32>
    %409 = vector.shape_cast %408 : vector<8xf32> to vector<8x1xf32>
    %410 = vector.broadcast %409 : vector<8x1xf32> to vector<8x8xf32>
    %411 = arith.subf %407, %410 : vector<8x8xf32>
    %412 = math.exp %411 : vector<8x8xf32>
    %cst_146 = arith.constant dense<0.000000e+00> : vector<8xf32>
    %413 = vector.multi_reduction <add>, %412, %cst_146 [1] : vector<8x8xf32> to vector<8xf32>
    %414 = vector.shape_cast %413 : vector<8xf32> to vector<8x1xf32>
    %415 = tpu.reciprocal %414 {approx = true} : vector<8x1xf32> -> vector<8x1xf32>
    %416 = vector.broadcast %415 : vector<8x1xf32> to vector<8x8xf32>
    %417 = arith.mulf %412, %416 : vector<8x8xf32>
    %cst_147 = arith.constant dense<0.000000e+00> : vector<8x8xf32>
    %418 = tpu.matmul %417, %404, %cst_147 {dimension_numbers = #tpu.dot_dimension_numbers<[1], [0], [0], [1], [0, 0, 1, 1], [], []>} : vector<8x8xf32>, vector<8x8xf32>, vector<8x8xf32> -> vector<8x8xf32>
    %419 = vector.extract_strided_slice %297 {offsets = [8, 0], sizes = [8, 32], strides = [1, 1]} : vector<32x32xf32> to vector<8x32xf32>
    %cst_148 = arith.constant dense<0.000000e+00> : vector<8x32xf32>
    %420 = tpu.matmul %418, %419, %cst_148 {dimension_numbers = #tpu.dot_dimension_numbers<[1], [0], [0], [1], [0, 0, 1, 1], [], []>} : vector<8x8xf32>, vector<8x32xf32>, vector<8x32xf32> -> vector<8x32xf32>
    %421 = arith.addf %401, %420 : vector<8x32xf32>
    %422 = vector.extract_strided_slice %293 {offsets = [8, 16], sizes = [8, 8], strides = [1, 1]} : vector<16x32xf32> to vector<8x8xf32>
    %423 = vector.extract_strided_slice %294 {offsets = [8, 16], sizes = [8, 8], strides = [1, 1]} : vector<16x32xf32> to vector<8x8xf32>
    %424 = vector.extract_strided_slice %295 {offsets = [8, 16], sizes = [8, 8], strides = [1, 1]} : vector<16x32xf32> to vector<8x8xf32>
    %cst_149 = arith.constant dense<0.000000e+00> : vector<8x8xf32>
    %425 = tpu.matmul %422, %423, %cst_149 {dimension_numbers = #tpu.dot_dimension_numbers<[1], [1], [0], [0], [0, 0, 1, 0], [], []>} : vector<8x8xf32>, vector<8x8xf32>, vector<8x8xf32> -> vector<8x8xf32>
    %426 = vector.broadcast %380 : vector<1x8xf32> to vector<8x8xf32>
    %427 = arith.addf %425, %426 : vector<8x8xf32>
    %cst_150 = arith.constant dense<0xFF800000> : vector<8xf32>
    %428 = vector.multi_reduction <maximumf>, %427, %cst_150 [1] : vector<8x8xf32> to vector<8xf32>
    %429 = vector.shape_cast %428 : vector<8xf32> to vector<8x1xf32>
    %430 = vector.broadcast %429 : vector<8x1xf32> to vector<8x8xf32>
    %431 = arith.subf %427, %430 : vector<8x8xf32>
    %432 = math.exp %431 : vector<8x8xf32>
    %cst_151 = arith.constant dense<0.000000e+00> : vector<8xf32>
    %433 = vector.multi_reduction <add>, %432, %cst_151 [1] : vector<8x8xf32> to vector<8xf32>
    %434 = vector.shape_cast %433 : vector<8xf32> to vector<8x1xf32>
    %435 = tpu.reciprocal %434 {approx = true} : vector<8x1xf32> -> vector<8x1xf32>
    %436 = vector.broadcast %435 : vector<8x1xf32> to vector<8x8xf32>
    %437 = arith.mulf %432, %436 : vector<8x8xf32>
    %cst_152 = arith.constant dense<0.000000e+00> : vector<8x8xf32>
    %438 = tpu.matmul %437, %424, %cst_152 {dimension_numbers = #tpu.dot_dimension_numbers<[1], [0], [0], [1], [0, 0, 1, 1], [], []>} : vector<8x8xf32>, vector<8x8xf32>, vector<8x8xf32> -> vector<8x8xf32>
    %439 = vector.extract_strided_slice %297 {offsets = [16, 0], sizes = [8, 32], strides = [1, 1]} : vector<32x32xf32> to vector<8x32xf32>
    %cst_153 = arith.constant dense<0.000000e+00> : vector<8x32xf32>
    %440 = tpu.matmul %438, %439, %cst_153 {dimension_numbers = #tpu.dot_dimension_numbers<[1], [0], [0], [1], [0, 0, 1, 1], [], []>} : vector<8x8xf32>, vector<8x32xf32>, vector<8x32xf32> -> vector<8x32xf32>
    %441 = arith.addf %421, %440 : vector<8x32xf32>
    %442 = vector.extract_strided_slice %293 {offsets = [8, 24], sizes = [8, 8], strides = [1, 1]} : vector<16x32xf32> to vector<8x8xf32>
    %443 = vector.extract_strided_slice %294 {offsets = [8, 24], sizes = [8, 8], strides = [1, 1]} : vector<16x32xf32> to vector<8x8xf32>
    %444 = vector.extract_strided_slice %295 {offsets = [8, 24], sizes = [8, 8], strides = [1, 1]} : vector<16x32xf32> to vector<8x8xf32>
    %cst_154 = arith.constant dense<0.000000e+00> : vector<8x8xf32>
    %445 = tpu.matmul %442, %443, %cst_154 {dimension_numbers = #tpu.dot_dimension_numbers<[1], [1], [0], [0], [0, 0, 1, 0], [], []>} : vector<8x8xf32>, vector<8x8xf32>, vector<8x8xf32> -> vector<8x8xf32>
    %446 = vector.broadcast %380 : vector<1x8xf32> to vector<8x8xf32>
    %447 = arith.addf %445, %446 : vector<8x8xf32>
    %cst_155 = arith.constant dense<0xFF800000> : vector<8xf32>
    %448 = vector.multi_reduction <maximumf>, %447, %cst_155 [1] : vector<8x8xf32> to vector<8xf32>
    %449 = vector.shape_cast %448 : vector<8xf32> to vector<8x1xf32>
    %450 = vector.broadcast %449 : vector<8x1xf32> to vector<8x8xf32>
    %451 = arith.subf %447, %450 : vector<8x8xf32>
    %452 = math.exp %451 : vector<8x8xf32>
    %cst_156 = arith.constant dense<0.000000e+00> : vector<8xf32>
    %453 = vector.multi_reduction <add>, %452, %cst_156 [1] : vector<8x8xf32> to vector<8xf32>
    %454 = vector.shape_cast %453 : vector<8xf32> to vector<8x1xf32>
    %455 = tpu.reciprocal %454 {approx = true} : vector<8x1xf32> -> vector<8x1xf32>
    %456 = vector.broadcast %455 : vector<8x1xf32> to vector<8x8xf32>
    %457 = arith.mulf %452, %456 : vector<8x8xf32>
    %cst_157 = arith.constant dense<0.000000e+00> : vector<8x8xf32>
    %458 = tpu.matmul %457, %444, %cst_157 {dimension_numbers = #tpu.dot_dimension_numbers<[1], [0], [0], [1], [0, 0, 1, 1], [], []>} : vector<8x8xf32>, vector<8x8xf32>, vector<8x8xf32> -> vector<8x8xf32>
    %459 = vector.extract_strided_slice %297 {offsets = [24, 0], sizes = [8, 32], strides = [1, 1]} : vector<32x32xf32> to vector<8x32xf32>
    %cst_158 = arith.constant dense<0.000000e+00> : vector<8x32xf32>
    %460 = tpu.matmul %458, %459, %cst_158 {dimension_numbers = #tpu.dot_dimension_numbers<[1], [0], [0], [1], [0, 0, 1, 1], [], []>} : vector<8x8xf32>, vector<8x32xf32>, vector<8x32xf32> -> vector<8x32xf32>
    %461 = arith.addf %441, %460 : vector<8x32xf32>
    %462 = tpu.concatenate %379, %461 in 0 : vector<8x32xf32>, vector<8x32xf32> -> vector<16x32xf32>
    %c1_159 = arith.constant 1 : index
    %c0_160 = arith.constant 0 : index
    %c0_161 = arith.constant 0 : index
    %463 = vector.load %arg7[%c1_159, %c0_160, %c0_161] : memref<2x1x32xf32, #tpu.memory_space<vmem>>, vector<1x1x32xf32>
    %464 = vector.shape_cast %463 : vector<1x1x32xf32> to vector<1x32xf32>
    %465 = vector.broadcast %464 : vector<1x32xf32> to vector<16x32xf32>
    %466 = arith.addf %462, %465 : vector<16x32xf32>
    %467 = arith.addf %285, %466 : vector<16x32xf32>
    %c1_162 = arith.constant 1 : index
    %c0_163 = arith.constant 0 : index
    %c0_164 = arith.constant 0 : index
    %468 = vector.load %arg8[%c1_162, %c0_163, %c0_164] : memref<2x1x32xf32, #tpu.memory_space<vmem>>, vector<1x1x32xf32>
    %469 = vector.shape_cast %468 : vector<1x1x32xf32> to vector<1x32xf32>
    %c1_165 = arith.constant 1 : index
    %c0_166 = arith.constant 0 : index
    %c0_167 = arith.constant 0 : index
    %470 = vector.load %arg9[%c1_165, %c0_166, %c0_167] : memref<2x1x32xf32, #tpu.memory_space<vmem>>, vector<1x1x32xf32>
    %471 = vector.shape_cast %470 : vector<1x1x32xf32> to vector<1x32xf32>
    %cst_168 = arith.constant dense<0.000000e+00> : vector<16xf32>
    %472 = vector.multi_reduction <add>, %467, %cst_168 [1] : vector<16x32xf32> to vector<16xf32>
    %473 = vector.shape_cast %472 : vector<16xf32> to vector<16x1xf32>
    %cst_169 = arith.constant 3.200000e+01 : f32
    %474 = vector.broadcast %cst_169 : f32 to vector<16x1xf32>
    %475 = arith.divf %473, %474 : vector<16x1xf32>
    %476 = vector.broadcast %475 : vector<16x1xf32> to vector<16x32xf32>
    %477 = arith.subf %467, %476 : vector<16x32xf32>
    %478 = arith.mulf %477, %477 : vector<16x32xf32>
    %cst_170 = arith.constant dense<0.000000e+00> : vector<16xf32>
    %479 = vector.multi_reduction <add>, %478, %cst_170 [1] : vector<16x32xf32> to vector<16xf32>
    %480 = vector.shape_cast %479 : vector<16xf32> to vector<16x1xf32>
    %cst_171 = arith.constant 3.200000e+01 : f32
    %481 = vector.broadcast %cst_171 : f32 to vector<16x1xf32>
    %482 = arith.divf %480, %481 : vector<16x1xf32>
    %cst_172 = arith.constant 9.99999974E-6 : f32
    %483 = vector.broadcast %cst_172 : f32 to vector<16x1xf32>
    %484 = arith.addf %482, %483 : vector<16x1xf32>
    %485 = math.rsqrt %484 : vector<16x1xf32>
    %486 = vector.broadcast %485 : vector<16x1xf32> to vector<16x32xf32>
    %487 = arith.mulf %477, %486 : vector<16x32xf32>
    %488 = vector.broadcast %469 : vector<1x32xf32> to vector<16x32xf32>
    %489 = arith.mulf %487, %488 : vector<16x32xf32>
    %490 = vector.broadcast %471 : vector<1x32xf32> to vector<16x32xf32>
    %491 = arith.addf %489, %490 : vector<16x32xf32>
    %c1_173 = arith.constant 1 : index
    %c0_174 = arith.constant 0 : index
    %c0_175 = arith.constant 0 : index
    %492 = vector.load %arg10[%c1_173, %c0_174, %c0_175] : memref<2x32x64xf32, #tpu.memory_space<vmem>>, vector<1x32x64xf32>
    %493 = vector.shape_cast %492 : vector<1x32x64xf32> to vector<32x64xf32>
    %cst_176 = arith.constant dense<0.000000e+00> : vector<16x64xf32>
    %494 = tpu.matmul %491, %493, %cst_176 {dimension_numbers = #tpu.dot_dimension_numbers<[1], [0], [0], [1], [0, 0, 1, 1], [], []>} : vector<16x32xf32>, vector<32x64xf32>, vector<16x64xf32> -> vector<16x64xf32>
    %c1_177 = arith.constant 1 : index
    %c0_178 = arith.constant 0 : index
    %c0_179 = arith.constant 0 : index
    %495 = vector.load %arg11[%c1_177, %c0_178, %c0_179] : memref<2x1x64xf32, #tpu.memory_space<vmem>>, vector<1x1x64xf32>
    %496 = vector.shape_cast %495 : vector<1x1x64xf32> to vector<1x64xf32>
    %497 = vector.broadcast %496 : vector<1x64xf32> to vector<16x64xf32>
    %498 = arith.addf %494, %497 : vector<16x64xf32>
    %499 = arith.mulf %498, %498 : vector<16x64xf32>
    %500 = arith.mulf %498, %499 : vector<16x64xf32>
    %cst_180 = arith.constant 4.471500e-02 : f32
    %501 = vector.broadcast %cst_180 : f32 to vector<16x64xf32>
    %502 = arith.mulf %501, %500 : vector<16x64xf32>
    %503 = arith.addf %498, %502 : vector<16x64xf32>
    %cst_181 = arith.constant 0.797884583 : f32
    %504 = vector.broadcast %cst_181 : f32 to vector<16x64xf32>
    %505 = arith.mulf %504, %503 : vector<16x64xf32>
    %506 = math.tanh %505 : vector<16x64xf32>
    %cst_182 = arith.constant 1.000000e+00 : f32
    %507 = vector.broadcast %cst_182 : f32 to vector<16x64xf32>
    %508 = arith.addf %507, %506 : vector<16x64xf32>
    %cst_183 = arith.constant 5.000000e-01 : f32
    %509 = vector.broadcast %cst_183 : f32 to vector<16x64xf32>
    %510 = arith.mulf %509, %508 : vector<16x64xf32>
    %511 = arith.mulf %498, %510 : vector<16x64xf32>
    %c1_184 = arith.constant 1 : index
    %c0_185 = arith.constant 0 : index
    %c0_186 = arith.constant 0 : index
    %512 = vector.load %arg12[%c1_184, %c0_185, %c0_186] : memref<2x64x32xf32, #tpu.memory_space<vmem>>, vector<1x64x32xf32>
    %513 = vector.shape_cast %512 : vector<1x64x32xf32> to vector<64x32xf32>
    %cst_187 = arith.constant dense<0.000000e+00> : vector<16x32xf32>
    %514 = tpu.matmul %511, %513, %cst_187 {dimension_numbers = #tpu.dot_dimension_numbers<[1], [0], [0], [1], [0, 0, 1, 1], [], []>} : vector<16x64xf32>, vector<64x32xf32>, vector<16x32xf32> -> vector<16x32xf32>
    %c1_188 = arith.constant 1 : index
    %c0_189 = arith.constant 0 : index
    %c0_190 = arith.constant 0 : index
    %515 = vector.load %arg13[%c1_188, %c0_189, %c0_190] : memref<2x1x32xf32, #tpu.memory_space<vmem>>, vector<1x1x32xf32>
    %516 = vector.shape_cast %515 : vector<1x1x32xf32> to vector<1x32xf32>
    %517 = vector.broadcast %516 : vector<1x32xf32> to vector<16x32xf32>
    %518 = arith.addf %514, %517 : vector<16x32xf32>
    %519 = arith.addf %491, %518 : vector<16x32xf32>
    %c1_191 = arith.constant 1 : index
    %c0_192 = arith.constant 0 : index
    %c0_193 = arith.constant 0 : index
    %520 = vector.load %arg14[%c1_191, %c0_192, %c0_193] : memref<2x1x32xf32, #tpu.memory_space<vmem>>, vector<1x1x32xf32>
    %521 = vector.shape_cast %520 : vector<1x1x32xf32> to vector<1x32xf32>
    %c1_194 = arith.constant 1 : index
    %c0_195 = arith.constant 0 : index
    %c0_196 = arith.constant 0 : index
    %522 = vector.load %arg15[%c1_194, %c0_195, %c0_196] : memref<2x1x32xf32, #tpu.memory_space<vmem>>, vector<1x1x32xf32>
    %523 = vector.shape_cast %522 : vector<1x1x32xf32> to vector<1x32xf32>
    %cst_197 = arith.constant dense<0.000000e+00> : vector<16xf32>
    %524 = vector.multi_reduction <add>, %519, %cst_197 [1] : vector<16x32xf32> to vector<16xf32>
    %525 = vector.shape_cast %524 : vector<16xf32> to vector<16x1xf32>
    %cst_198 = arith.constant 3.200000e+01 : f32
    %526 = vector.broadcast %cst_198 : f32 to vector<16x1xf32>
    %527 = arith.divf %525, %526 : vector<16x1xf32>
    %528 = vector.broadcast %527 : vector<16x1xf32> to vector<16x32xf32>
    %529 = arith.subf %519, %528 : vector<16x32xf32>
    %530 = arith.mulf %529, %529 : vector<16x32xf32>
    %cst_199 = arith.constant dense<0.000000e+00> : vector<16xf32>
    %531 = vector.multi_reduction <add>, %530, %cst_199 [1] : vector<16x32xf32> to vector<16xf32>
    %532 = vector.shape_cast %531 : vector<16xf32> to vector<16x1xf32>
    %cst_200 = arith.constant 3.200000e+01 : f32
    %533 = vector.broadcast %cst_200 : f32 to vector<16x1xf32>
    %534 = arith.divf %532, %533 : vector<16x1xf32>
    %cst_201 = arith.constant 9.99999974E-6 : f32
    %535 = vector.broadcast %cst_201 : f32 to vector<16x1xf32>
    %536 = arith.addf %534, %535 : vector<16x1xf32>
    %537 = math.rsqrt %536 : vector<16x1xf32>
    %538 = vector.broadcast %537 : vector<16x1xf32> to vector<16x32xf32>
    %539 = arith.mulf %529, %538 : vector<16x32xf32>
    %540 = vector.broadcast %521 : vector<1x32xf32> to vector<16x32xf32>
    %541 = arith.mulf %539, %540 : vector<16x32xf32>
    %542 = vector.broadcast %523 : vector<1x32xf32> to vector<16x32xf32>
    %543 = arith.addf %541, %542 : vector<16x32xf32>
    %c0_202 = arith.constant 0 : index
    %c0_203 = arith.constant 0 : index
    %544 = vector.load %arg16[%c0_202, %c0_203] : memref<16x32xf32, #tpu.memory_space<vmem>>, vector<16x32xf32>
    tpu.vector_store %arg16[%c0_202, %c0_203], %543 {strides = array<i32>} : memref<16x32xf32, #tpu.memory_space<vmem>>, vector<16x32xf32>,
    return
  }
}

</mosaic_0001>

<bundles_post_ra>
// kernel: tpu_custom_call.1
= control target key start
LH: loop header
LB: loop body
LE: loop exit
PB: predicated region body
PF: predicated region fallthrough
CT: control target
= control target key end

     0   :  { %s6458_s0 = inlined_call_operand.hbm [shape: f32[16,32], index: 0, kind: input, shape index: {}]   ;;  %s6459_s1 = inlined_call_operand.vmem [shape: f32[2,8], index: 1, kind: input, shape index: {}]   ;;  %s6460_s2 = inlined_call_operand.hbm [shape: f32[1,32], index: 2, kind: input, shape index: {}]   ;;  %s6461_s3 = inlined_call_operand.hbm [shape: f32[1,32], index: 3, kind: input, shape index: {}]   ;;  %s6462_s4 = inlined_call_operand.vmem [shape: f32[2,32,96], index: 4, kind: input, shape index: {}]   ;;  %s6463_s5 = inlined_call_operand.vmem [shape: f32[2,1,96], index: 5, kind: input, shape index: {}]   ;;  %s6464_s6 = inlined_call_operand.vmem [shape: f32[2,32,32], index: 6, kind: input, shape index: {}]   ;;  %s6465_s7 = inlined_call_operand.vmem [shape: f32[2,1,32], index: 7, kind: input, shape index: {}]   ;;  %s6466_s8 = inlined_call_operand.vmem [shape: f32[2,1,32], index: 8, kind: input, shape index: {}]   ;;  %s6467_s9 = inlined_call_operand.vmem [shape: f32[2,1,32], index: 9, kind: input, shape index: {}]   ;;  %s6468_s10 = inlined_call_operand.vmem [shape: f32[2,32,64], index: 10, kind: input, shape index: {}]   ;;  %s6469_s11 = inlined_call_operand.vmem [shape: f32[2,1,64], index: 11, kind: input, shape index: {}]   ;;  %s6470_s12 = inlined_call_operand.vmem [shape: f32[2,64,32], index: 12, kind: input, shape index: {}]   ;;  %s6471_s13 = inlined_call_operand.vmem [shape: f32[2,1,32], index: 13, kind: input, shape index: {}]   ;;  %s6472_s14 = inlined_call_operand.vmem [shape: f32[2,1,32], index: 14, kind: input, shape index: {}]   ;;  %s6473_s15 = inlined_call_operand.vmem [shape: f32[2,1,32], index: 15, kind: input, shape index: {}]   ;;  %s6474_s16 = inlined_call_operand.hbm [shape: f32[16,32], index: 16, kind: output, shape index: {}]  }
   0x1   :  { %6480 = sst [smem:[#allocation12_spill]] %s6458_s0 }
   0x2   :  { %21 = vsyncpa [#allocation3], 0 }
   0x3   :  { %22 = vsyncpa [#allocation6], 0 }
   0x4   :  { %23 = vsyncpa [#allocation4], 0  ;;  %s5655_s21 = smov [#allocation5]   ;;  %s5656_s23 = smov [#allocation2]  }
   0x5   :  { %s44_s22 = sshll.u32 %s5655_s21, 4  ;;  %s29_s24 = sshll.u32 %s5656_s23, 4  ;;  %s45_s22 = int_to_ptr.vmem [resolvable:$true] %s44_s22  ;;  %s5759_s24 = int_to_ptr.vmem [resolvable:$true] %s29_s24 }
   0x6   :  { %s5561_s27 = scalar_lea.hbm %s6460_s2, 16 }
   0x7   :  { %p5562_p0 = scmp.ne.s32.totalorder %s6460_s2, %s5561_s27  ;;  %p5565_p1 = scmp.lt.u32.totalorder %s5561_s27, %s6460_s2 }
   0x9   :  { %p5567_p2 = pnand %p5565_p1, %p5562_p0 }
   0xb   :  { %5570 = shalt.err (!%p5567_p2)
}
   0xc   :  { %s5571_s17 = scalar_lea.vmem %s45_s22, 16  ;;  %s5575_s18 = scalar_lea.vmem %s45_s22, 32 }
   0xd   :  { %p5572_p3 = scmp.ne.s32.totalorder %s45_s22, %s5571_s17  ;;  %p5576_p4 = scmp.lt.s32.totalorder %s45_s22, %s45_s22 }
   0xe   :  { %p5577_p5 = scmp.lt.s32.totalorder %s5575_s18, %s5571_s17 }
  0x10   :  { %p5578_p6 = por %p5577_p5, %p5576_p4 }
  0x12   :  { %p5579_p7 = pnand %p5578_p6, %p5572_p3 }
  0x14   :  { %5582 = shalt.err (!%p5579_p7)
}
  0x15   :  { %47 = dma.hbm_to_vmem [thread:$0]  %s6460_s2, 16, %s45_s22, [#allocation6]  }
  0x16   :  { %s6481_s25 = sld [smem:[#allocation12_spill]] }
  0x1c   :  { %s5583_s26 = scalar_lea.hbm %s6481_s25, 256 }
  0x1d   :  { %p5584_p8 = scmp.ne.s32.totalorder %s6481_s25, %s5583_s26  ;;  %p5587_p9 = scmp.lt.u32.totalorder %s5583_s26, %s6481_s25 }
  0x1f   :  { %p5589_p10 = pnand %p5587_p9, %p5584_p8 }
  0x21   :  { %5592 = shalt.err (!%p5589_p10)
}
  0x22   :  { %s5593_s0 = scalar_lea.vmem %s5759_s24, 256  ;;  %p5598_p12 = scmp.lt.s32.totalorder %s5759_s24, %s5759_s24 }
  0x23   :  { %p5594_p11 = scmp.ne.s32.totalorder %s5759_s24, %s5593_s0  ;;  %p5599_p13 = scmp.lt.s32.totalorder %s5593_s0, %s5593_s0 }
  0x25   :  { %p5600_p0 = por %p5599_p13, %p5598_p12 }
  0x27   :  { %p5601_p1 = pnand %p5600_p0, %p5594_p11 }
  0x29   :  { %5604 = shalt.err (!%p5601_p1)
}
  0x2a   :  { %s6476_s2 = smov 128   ;;  %s6477_s22 = smov 8  }
  0x2b   :  { %35 = dma.hbm_to_vmem [thread:$0]  %s6481_s25, 256, %s5759_s24, [#allocation3], %s6476_s2, %s6476_s2, %s6477_s22  }
  0x2c   :  { %s5659_s19 = smov [#allocation7]   ;;  %s5605_s26 = scalar_lea.hbm %s6461_s3, 16 }
  0x2d   :  { %s54_s20 = sshll.u32 %s5659_s19, 4  ;;  %p5606_p2 = scmp.ne.s32.totalorder %s6461_s3, %s5605_s26  ;;  %s55_s20 = int_to_ptr.vmem [resolvable:$true] %s54_s20 }
  0x2e   :  { %p5609_p3 = scmp.lt.u32.totalorder %s5605_s26, %s6461_s3 }
  0x30   :  { %p5611_p4 = pnand %p5609_p3, %p5606_p2 }
  0x32   :  { %5614 = shalt.err (!%p5611_p4)
}
  0x33   :  { %s5615_s0 = scalar_lea.vmem %s55_s20, 16  ;;  %s5619_s24 = scalar_lea.vmem %s55_s20, 32 }
  0x34   :  { %p5616_p5 = scmp.ne.s32.totalorder %s55_s20, %s5615_s0  ;;  %p5620_p6 = scmp.lt.s32.totalorder %s55_s20, %s55_s20 }
  0x35   :  { %p5621_p7 = scmp.lt.s32.totalorder %s5619_s24, %s5615_s0 }
  0x37   :  { %p5622_p8 = por %p5621_p7, %p5620_p6 }
  0x39   :  { %p5623_p9 = pnand %p5622_p8, %p5616_p5 }
  0x3b   :  { %5626 = shalt.err (!%p5623_p9)
}
  0x3c   :  { %57 = dma.hbm_to_vmem [thread:$0]  %s6461_s3, 16, %s55_s20, [#allocation6]  }
  0x3d   :  { %5649 = dma.done.wait [#allocation3], 256  }
  0x3e   :  { %5650 = vsyncadd [#allocation3], 4294967040 }
  0x3f   :  { %5651 = dma.done.wait [#allocation6], 32  }
  0x40   :  { %5652 = vsyncadd [#allocation6], 4294967264  ;;  %vm95_vm0 = vcmask 261120   ;;  %v91_v0 = vld [vmem:[#allocation2] sm:$0xff]  ;;  %v92_v1 = vld [vmem:[#allocation2 + $0x8] sm:$0xff]  ;;  %v5660_v36 = vmov 0.0   ;;  %v238_v45 = vlaneseq }
  0x41   :  { %v96_v2 = vsel %vm95_vm0, %v91_v0, 0.0  ;;  %v99_v3 = vsel %vm95_vm0, %v92_v1, 0.0  ;;  %v142_v14 = vld [vmem:[%s6462_s4] sm:$0xff]  ;;  %v143_v15 = vld [vmem:[%s6462_s4 + $0x8] sm:$0xff]  ;;  %v144_v16 = vld [vmem:[%s6462_s4 + $0x10] sm:$0xff]  ;;  %5080 = vmatprep.subr.mxu1 %v5660_v36  ;;  %vm5661_vm1 = vmmov 0  }
  0x42   :  { %97 = vadd.xlane.f32.xlu0 %v96_v2  ;;  %v5386_v17 = vpack.c.bf16 %v143_v15, %v142_v14  ;;  %v145_v18 = vld [vmem:[%s6462_s4 + $0x18] sm:$0xff]  ;;  %v4802_v27 = vld [vmem:[#allocation5] ss:$0 sm:$0xff]  ;;  %v4803_v29 = vld [vmem:[#allocation7] ss:$0 sm:$0xff]  ;;  %5082 = vmatprep.mubr.msk.f32.mxu1 %vm5661_vm1, %v5660_v36  ;;  %s5662_s30 = smov 88  }
  0x43   :  { %v5390_v19 = vpack.c.bf16 %v145_v18, %v144_v16  ;;  %v4804_v37 = vld [vmem:[%s6463_s5] ss:$0 sm:$0xff]  ;;  %s5663_s0 = smov 96   ;;  %s5664_s24 = smov 120   ;;  %vm245_vm2 = vcmask 64512   ;;  %v5862_v48 = vshrl.u32 %v238_v45, 7 }
  0x44   :  { %5387 = vmatprep.subr.bf16.mxu0 %v5386_v17  ;;  %v139_v46 = vld [vmem:[%s6459_s1] sm:$0x3]  ;;  %s5665_s1 = smov 64   ;;  %s5666_s3 = smov 80   ;;  %vm2333_vm3 = vcmask 523264  }
  0x45   :  { %5389 = vmatpush3.bf16.msra.mxu0 %v5386_v17  ;;  %v140_v47 = vsub.f32 1.0, %v139_v46  ;;  %v240_v50 = vsub.s32 0, %v5862_v48  ;;  %s5667_s18 = smov 112   ;;  %s5668_s19 = smov 56   ;;  %v5902_v15 = vld [vmem:[%s6464_s6] sm:$0xff] }
  0x46   :  { %100 = vadd.xlane.f32.xlu0 %v99_v3  ;;  %5391 = vmatprep.subr.bf16.mxu0 %v5390_v19  ;;  %s5669_s28 = smov 72   ;;  %s5670_s27 = smov 104  }
  0x47   :  { %v5864_v49 = vmul.f32 -1e+09, %v140_v47  ;;  %s5671_s29 = smov 48   ;;  %v5942_v47 = vld [vmem:[%s6464_s6 + $0x10] sm:$0xff]  ;;  %s6478_s20 = smov 40  }
  0x49   :  { %5393 = vmatpush3.bf16.msra.mxu0 %v5390_v19  ;;  %v5868_v51 = vrot.slane %v5864_v49, %v240_v50 }
  0x4a   :  { %5075 = vmatprep.subr.mxu0 %v5660_v36 }
  0xcf   :  { %v98_v4 = vpop.xlane.xlu0 %97 }
  0xd0   :  { %v103_v5 = vmul.f32 0.03125, %v98_v4 }
  0xd2   :  { %v105_v6 = vsub.f32 %v91_v0, %v103_v5 }
  0xd3   :  { %v101_v7 = vpop.xlane.xlu0 %100 }
  0xd4   :  { %v104_v8 = vmul.f32 0.03125, %v101_v7  ;;  %v107_v9 = vmul.f32 %v105_v6, %v105_v6  ;;  %v5888_v7 = vld [vmem:[%s6464_s6 + $0x8] sm:$0xff] }
  0xd6   :  { %v106_v10 = vsub.f32 %v92_v1, %v104_v8  ;;  %v109_v11 = vsel %vm95_vm0, %v107_v9, 0.0 }
  0xd7   :  { %110 = vadd.xlane.f32.xlu1 %v109_v11 }
  0xd8   :  { %v108_v12 = vmul.f32 %v106_v10, %v106_v10 }
  0xda   :  { %v112_v13 = vsel %vm95_vm0, %v108_v12, 0.0 }
  0xdb   :  { %113 = vadd.xlane.f32.xlu1 %v112_v13 }
 0x164   :  { %v111_v20 = vpop.xlane.xlu1 %110 }
 0x165   :  { %v115_v21 = vmul.f32 0.03125, %v111_v20 }
 0x167   :  { %v117_v22 = vadd.f32 1e-05, %v115_v21 }
 0x168   :  { %v114_v23 = vpop.xlane.xlu1 %113 }
 0x169   :  { %5469 = vrsqrt.f32 %v117_v22  ;;  %v116_v24 = vmul.f32 0.03125, %v114_v23 }
 0x16b   :  { %v118_v25 = vadd.f32 1e-05, %v116_v24 }
 0x16d   :  { %5471 = vrsqrt.f32 %v118_v25 }
 0x173   :  { %v5470_v26 = vpop.eup %5469 }
 0x174   :  { %v121_v28 = vmul.f32 %v5470_v26, %v105_v6 }
 0x176   :  { %v129_v30 = vmul.f32 %v4802_v27, %v121_v28 }
 0x177   :  { %v5472_v31 = vpop.eup %5471 }
 0x178   :  { %v122_v32 = vmul.f32 %v5472_v31, %v106_v10  ;;  %v5821_v33 = vadd.f32 %v4803_v29, %v129_v30 }
 0x17a   :  { %v130_v34 = vmul.f32 %v4802_v27, %v122_v32  ;;  %5072 = vmatprep.mubr.msk.f32.mxu0 %vm95_vm0, %v5821_v33 }
 0x17c   :  { %v5825_v35 = vadd.f32 %v4803_v29, %v130_v34 }
 0x17e   :  { %5073 = vmatmul.mubr.msk.f32.vlgmr.msra.gmra.mrb[0].mxu0 %vm95_vm0, %v5825_v35 }
 0x17f   :  { %5077 = vmatprep.mubr.msk.f32.mxu0 %vm5661_vm1, %v5660_v36 }
 0x251   :  { %v5074_v38 = vpop.f32.mrb[0].mxu0 }
 0x252   :  { %v5838_v39 = vadd.f32 %v5074_v38, %v4804_v37  ;;  %v225_v40 = vpop.f32.mrb[1].mxu0 }
 0x253   :  { %v5840_v41 = vadd.f32 %v4804_v37, %v225_v40 }
 0x255   :  { %409 = vrot.lane.b32.xlu1 %v5840_v41, %s5662_s30  ;;  %243 = vrot.lane.b32.xlu0 %v5840_v41, %s5663_s0 }
 0x259   :  { %407 = vrot.lane.b32.xlu1 %v5840_v41, %s5664_s24 }
 0x2c7   :  { %v244_v42 = vpop.permute.xlu0 %243  ;;  %v410_v43 = vpop.permute.xlu1 %409 }
 0x2c8   :  { %5076 = vmatpush3.xpose.msk.msra.mxu0 %vm245_vm2, %v244_v42 }
 0x2c9   :  { %5085 = vmatprep.subr.mxu0 %v5660_v36 }
 0x2cb   :  { %5078 = vmatmul.mubr.msk.f32.vlgmr.msra.gmra.mrb[2].mxu0 %vm245_vm2, %v5840_v41  ;;  %v408_v44 = vpop.permute.xlu1 %407 }
 0x2cc   :  { %5086 = vmatpush3.xpose.msk.msra.mxu0 %vm245_vm2, %v410_v43  ;;  %5087 = vmatprep.mubr.msk.f32.mxu0 %vm5661_vm1, %v5660_v36 }
 0x2cd   :  { %5095 = vmatprep.subr.mxu0 %v5660_v36 }
 0x2cf   :  { %5088 = vmatmul.mubr.msk.f32.vlgmr.msra.gmra.mrb[4].mxu0 %vm245_vm2, %v408_v44 }
 0x2d0   :  { %5097 = vmatprep.mubr.msk.f32.mxu0 %vm5661_vm1, %v5660_v36  ;;  %5096 = vmatpush3.msra.mxu0 %v5888_v7 }
 0x2d1   :  { %5105 = vmatprep.subr.mxu0 %v5660_v36 }
 0x39e   :  { %v316_v52 = vpop.f32.mrb[2].mxu0 }
 0x39f   :  { %v317_v53 = vadd.f32 %v316_v52, %v5868_v51  ;;  %v5079_v54 = vpop.f32.mrb[3].mxu0 }
 0x3a1   :  { %v320_v55 = vsel %vm245_vm2, %v317_v53, -inf }
 0x3a2   :  { %321 = vmax.xlane.f32.xlu1 %v320_v55  ;;  %v481_v56 = vpop.f32.mrb[4].mxu0 }
 0x3a3   :  { %v482_v57 = vadd.f32 %v481_v56, %v5868_v51  ;;  %v5089_v58 = vpop.f32.mrb[5].mxu0 }
 0x3a5   :  { %v485_v59 = vsel %vm245_vm2, %v482_v57, -inf }
 0x3a6   :  { %486 = vmax.xlane.f32.xlu0 %v485_v59 }
 0x3b3   :  { %331 = vrot.lane.b32.xlu1 %v5840_v41, %s5665_s1 }
 0x3b7   :  { %720 = vrot.lane.b32.xlu1 %v5840_v41, %s5666_s3 }
 0x3bb   :  { %718 = vrot.lane.b32.xlu1 %v5840_v41, %s5667_s18 }
 0x42f   :  { %v322_v60 = vpop.xlane.xlu1 %321 }
 0x430   :  { %v323_v61 = vsub.f32 %v317_v53, %v322_v60 }
 0x432   :  { %v324_v62 = vmul.f32 1.442695, %v323_v61 }
 0x433   :  { %v332_v63 = vpop.permute.xlu1 %331  ;;  %v487_v0 = vpop.xlane.xlu0 %486 }
 0x434   :  { %5473 = vpow2.f32 %v324_v62  ;;  %v488_v1 = vsub.f32 %v482_v57, %v487_v0  ;;  %5081 = vmatpush3.msra.mxu1 %v332_v63 }
 0x435   :  { %5090 = vmatprep.subr.mxu1 %v5660_v36 }
 0x436   :  { %v489_v2 = vmul.f32 1.442695, %v488_v1 }
 0x437   :  { %v721_v18 = vpop.permute.xlu1 %720 }
 0x438   :  { %5475 = vpow2.f32 %v489_v2 }
 0x43b   :  { %v719_v21 = vpop.permute.xlu1 %718 }
 0x43e   :  { %v5474_v3 = vpop.eup %5473 }
 0x43f   :  { %v326_v4 = vsel %vm245_vm2, %v5474_v3, 0.0 }
 0x440   :  { %327 = vadd.xlane.f32.xlu0 %v326_v4 }
 0x442   :  { %v5476_v5 = vpop.eup %5475 }
 0x443   :  { %v491_v6 = vsel %vm245_vm2, %v5476_v5, 0.0 }
 0x444   :  { %492 = vadd.xlane.f32.xlu0 %v491_v6 }
 0x45a   :  { %496 = vrot.lane.b32.xlu0 %v5840_v41, %s5668_s19 }
 0x4cd   :  { %v328_v8 = vpop.xlane.xlu0 %327 }
 0x4ce   :  { %5477 = vrcp.f32 %v328_v8  ;;  %v5979_v8 = vld [vmem:[%s6464_s6 + $0x18] sm:$0xff] }
 0x4d1   :  { %v493_v9 = vpop.xlane.xlu0 %492 }
 0x4d2   :  { %5479 = vrcp.f32 %v493_v9  ;;  %v1198_v9 = vsub.s32 1, %v5862_v48 }
 0x4d5   :  { %v497_v12 = vpop.permute.xlu0 %496 }
 0x4d8   :  { %v5478_v10 = vpop.eup %5477 }
 0x4d9   :  { %v330_v11 = vmul.f32 %v5478_v10, %v5474_v3 }
 0x4db   :  { %5083 = vmatmul.mubr.msk.f32.vlgmr.msra.gmra.mrb[0].mxu1 %vm245_vm2, %v330_v11 }
 0x4dc   :  { %v5480_v13 = vpop.eup %5479  ;;  %5091 = vmatpush3.msra.mxu1 %v497_v12  ;;  %5092 = vmatprep.mubr.msk.f32.mxu1 %vm5661_vm1, %v5660_v36 }
 0x4dd   :  { %v495_v14 = vmul.f32 %v5480_v13, %v5476_v5  ;;  %5100 = vmatprep.subr.mxu1 %v5660_v36 }
 0x4df   :  { %5093 = vmatmul.mubr.msk.f32.vlgmr.msra.gmra.mrb[2].mxu1 %vm245_vm2, %v495_v14 }
 0x4e0   :  { %5102 = vmatprep.mubr.msk.f32.mxu1 %vm5661_vm1, %v5660_v36  ;;  %5101 = vmatpush3.msra.mxu1 %v5902_v15 }
 0x4e1   :  { %5110 = vmatprep.subr.mxu1 %v5660_v36 }
 0x5ae   :  { %v403_v16 = vpop.f32.mrb[0].mxu1 }
 0x5af   :  { %v5084_v17 = vpop.f32.mrb[1].mxu1  ;;  %5103 = vmatmul.mubr.msk.f32.vlgmr.msra.gmra.mrb[4].mxu1 %vm245_vm2, %v403_v16 }
 0x5b0   :  { %5112 = vmatprep.mubr.msk.f32.mxu1 %vm5661_vm1, %v5660_v36 }
 0x5b2   :  { %v568_v19 = vpop.f32.mrb[2].mxu1 }
 0x5b3   :  { %v5094_v20 = vpop.f32.mrb[3].mxu1  ;;  %5098 = vmatmul.mubr.msk.f32.vlgmr.msra.gmra.mrb[6].mxu0 %vm245_vm2, %v568_v19 }
 0x5b4   :  { %5106 = vmatpush3.xpose.msk.msra.mxu0 %vm245_vm2, %v721_v18  ;;  %5107 = vmatprep.mubr.msk.f32.mxu0 %vm5661_vm1, %v5660_v36 }
 0x5b5   :  { %5115 = vmatprep.subr.mxu0 %v5660_v36 }
 0x5b7   :  { %5108 = vmatmul.mubr.msk.f32.vlgmr.msra.gmra.mrb[8].mxu0 %vm245_vm2, %v719_v21 }
 0x5b8   :  { %5117 = vmatprep.mubr.msk.f32.mxu0 %vm5661_vm1, %v5660_v36  ;;  %5116 = vmatpush3.msra.mxu0 %v5942_v47 }
 0x5b9   :  { %5125 = vmatprep.subr.mxu0 %v5660_v36 }
 0x682   :  { %v714_v22 = vpop.f32.mrb[4].mxu1 }
 0x683   :  { %v5104_v23 = vpop.f32.mrb[5].mxu1 }
 0x686   :  { %v641_v24 = vpop.f32.mrb[6].mxu0 }
 0x687   :  { %v5917_v25 = vadd.f32 %v714_v22, %v641_v24  ;;  %v5099_v26 = vpop.f32.mrb[7].mxu0 }
 0x68a   :  { %v792_v27 = vpop.f32.mrb[8].mxu0 }
 0x68b   :  { %v793_v28 = vadd.f32 %v792_v27, %v5868_v51  ;;  %v5109_v29 = vpop.f32.mrb[9].mxu0 }
 0x68d   :  { %v796_v30 = vsel %vm245_vm2, %v793_v28, -inf }
 0x68e   :  { %797 = vmax.xlane.f32.xlu1 %v796_v30 }
 0x69f   :  { %959 = vrot.lane.b32.xlu1 %v5840_v41, %s5669_s28 }
 0x6a3   :  { %957 = vrot.lane.b32.xlu1 %v5840_v41, %s5670_s27 }
 0x6a7   :  { %1201 = vrot.lane.b32.xlu1 %v5838_v39, %s5663_s0 }
 0x71b   :  { %v798_v31 = vpop.xlane.xlu1 %797 }
 0x71c   :  { %v799_v32 = vsub.f32 %v793_v28, %v798_v31 }
 0x71e   :  { %v800_v34 = vmul.f32 1.442695, %v799_v32 }
 0x71f   :  { %v960_v44 = vpop.permute.xlu1 %959 }
 0x720   :  { %5481 = vpow2.f32 %v800_v34 }
 0x723   :  { %v958_v46 = vpop.permute.xlu1 %957 }
 0x727   :  { %v1202_v1 = vpop.permute.xlu1 %1201 }
 0x72a   :  { %v5482_v37 = vpop.eup %5481 }
 0x72b   :  { %v802_v38 = vsel %vm245_vm2, %v5482_v37, 0.0 }
 0x72c   :  { %803 = vadd.xlane.f32.xlu0 %v802_v38 }
 0x742   :  { %807 = vrot.lane.b32.xlu0 %v5840_v41, %s5671_s29 }
 0x7b9   :  { %v804_v40 = vpop.xlane.xlu0 %803 }
 0x7ba   :  { %5483 = vrcp.f32 %v804_v40 }
 0x7bd   :  { %v808_v42 = vpop.permute.xlu0 %807 }
 0x7be   :  { %5111 = vmatpush3.msra.mxu1 %v808_v42 }
 0x7bf   :  { %5120 = vmatprep.subr.mxu1 %v5660_v36 }
 0x7c4   :  { %v5484_v43 = vpop.eup %5483 }
 0x7c5   :  { %v806_v45 = vmul.f32 %v5484_v43, %v5482_v37 }
 0x7c7   :  { %5113 = vmatmul.mubr.msk.f32.vlgmr.msra.gmra.mrb[6].mxu1 %vm245_vm2, %v806_v45 }
 0x7c8   :  { %5121 = vmatpush3.xpose.msk.msra.mxu1 %vm245_vm2, %v960_v44  ;;  %5122 = vmatprep.mubr.msk.f32.mxu1 %vm5661_vm1, %v5660_v36 }
 0x7c9   :  { %5130 = vmatprep.subr.mxu1 %v5660_v36 }
 0x7cb   :  { %5123 = vmatmul.mubr.msk.f32.vlgmr.msra.gmra.mrb[8].mxu1 %vm245_vm2, %v958_v46 }
 0x7cc   :  { %5132 = vmatprep.mubr.msk.f32.mxu1 %vm5661_vm1, %v5660_v36  ;;  %5131 = vmatpush3.msra.mxu1 %v5979_v8 }
 0x7cd   :  { %5140 = vmatprep.subr.mxu1 %v5660_v36 }
 0x89a   :  { %v879_v50 = vpop.f32.mrb[6].mxu1 }
 0x89b   :  { %v5114_v52 = vpop.f32.mrb[7].mxu1  ;;  %5118 = vmatmul.mubr.msk.f32.vlgmr.msra.gmra.mrb[10].mxu0 %vm245_vm2, %v879_v50 }
 0x89c   :  { %5127 = vmatprep.mubr.msk.f32.mxu0 %vm5661_vm1, %v5660_v36 }
 0x89e   :  { %v1031_v53 = vpop.f32.mrb[8].mxu1 }
 0x89f   :  { %v1032_v54 = vadd.f32 %v1031_v53, %v5868_v51  ;;  %v5124_v55 = vpop.f32.mrb[9].mxu1 }
 0x8a1   :  { %v1035_v56 = vsel %vm245_vm2, %v1032_v54, -inf }
 0x8a2   :  { %1036 = vmax.xlane.f32.xlu0 %v1035_v56 }
 0x8b8   :  { %1046 = vrot.lane.b32.xlu0 %v5840_v41, %s6478_s20 }
 0x8bc   :  { %1366 = vrot.lane.b32.xlu0 %v5838_v39, %s5662_s30 }
 0x92f   :  { %v1037_v57 = vpop.xlane.xlu0 %1036 }
 0x930   :  { %v1038_v58 = vsub.f32 %v1032_v54, %v1037_v57 }
 0x932   :  { %v1039_v59 = vmul.f32 1.442695, %v1038_v58 }
 0x933   :  { %v1047_v60 = vpop.permute.xlu0 %1046 }
 0x934   :  { %5485 = vpow2.f32 %v1039_v59  ;;  %5126 = vmatpush3.msra.mxu0 %v1047_v60 }
 0x935   :  { %5135 = vmatprep.subr.mxu0 %v5660_v36 }
 0x937   :  { %v1367_v5 = vpop.permute.xlu0 %1366 }
 0x93e   :  { %v5486_v61 = vpop.eup %5485 }
 0x93f   :  { %v1041_v62 = vsel %vm245_vm2, %v5486_v61, 0.0 }
 0x940   :  { %1042 = vadd.xlane.f32.xlu1 %v1041_v62 }
 0x951   :  { %1364 = vrot.lane.b32.xlu1 %v5838_v39, %s5664_s24 }
 0x96e   :  { %v952_v63 = vpop.f32.mrb[10].mxu0 }
 0x96f   :  { %v956_v41 = vadd.f32 %v952_v63, %v5917_v25  ;;  %v5119_v0 = vpop.f32.mrb[11].mxu0 }
 0x9cd   :  { %v1043_v2 = vpop.xlane.xlu1 %1042 }
 0x9ce   :  { %5487 = vrcp.f32 %v1043_v2 }
 0x9d1   :  { %v1365_v6 = vpop.permute.xlu1 %1364 }
 0x9d8   :  { %v5488_v3 = vpop.eup %5487 }
 0x9d9   :  { %v1045_v4 = vmul.f32 %v5488_v3, %v5486_v61 }
 0x9db   :  { %5128 = vmatmul.mubr.msk.f32.vlgmr.msra.gmra.mrb[12].mxu0 %vm245_vm2, %v1045_v4 }
 0x9dc   :  { %5136 = vmatpush3.xpose.msk.msra.mxu0 %vm245_vm2, %v1202_v1  ;;  %5137 = vmatprep.mubr.msk.f32.mxu0 %vm5661_vm1, %v5660_v36 }
 0x9dd   :  { %5145 = vmatprep.subr.mxu0 %v5660_v36 }
 0x9df   :  { %5138 = vmatmul.mubr.msk.f32.vlgmr.msra.gmra.mrb[14].mxu0 %vm245_vm2, %v5838_v39 }
 0x9e0   :  { %5146 = vmatpush3.xpose.msk.msra.mxu0 %vm245_vm2, %v1367_v5  ;;  %5147 = vmatprep.mubr.msk.f32.mxu0 %vm5661_vm1, %v5660_v36 }
 0x9e1   :  { %5155 = vmatprep.subr.mxu0 %v5660_v36 }
 0x9e3   :  { %5148 = vmatmul.mubr.msk.f32.vlgmr.msra.gmra.mrb[16].mxu0 %vm245_vm2, %v1365_v6 }
 0x9e4   :  { %5156 = vmatpush3.msra.mxu0 %v5888_v7  ;;  %5157 = vmatprep.mubr.msk.f32.mxu0 %vm5661_vm1, %v5660_v36  ;;  %v5986_v7 = vrot.slane %v5864_v49, %v1198_v9 }
 0x9e5   :  { %5165 = vmatprep.subr.mxu0 %v5660_v36 }
 0xaae   :  { %v1118_v10 = vpop.f32.mrb[12].mxu0 }
 0xaaf   :  { %v5129_v11 = vpop.f32.mrb[13].mxu0  ;;  %5133 = vmatmul.mubr.msk.f32.vlgmr.msra.gmra.mrb[10].mxu1 %vm245_vm2, %v1118_v10  ;;  %v4839_v10 = vld [vmem:[%s6465_s7] ss:$0 sm:$0xff] }
 0xab0   :  { %5142 = vmatprep.mubr.msk.f32.mxu1 %vm5661_vm1, %v5660_v36 }
 0xab2   :  { %v1273_v12 = vpop.f32.mrb[14].mxu0 }
 0xab3   :  { %v1274_v13 = vadd.f32 %v1273_v12, %v5986_v7  ;;  %v5139_v14 = vpop.f32.mrb[15].mxu0 }
 0xab5   :  { %v1277_v16 = vsel %vm245_vm2, %v1274_v13, -inf }
 0xab6   :  { %1278 = vmax.xlane.f32.xlu0 %v1277_v16  ;;  %v1438_v17 = vpop.f32.mrb[16].mxu0 }
 0xab7   :  { %v1439_v48 = vadd.f32 %v1438_v17, %v5986_v7  ;;  %v5149_v18 = vpop.f32.mrb[17].mxu0 }
 0xab9   :  { %v1442_v19 = vsel %vm245_vm2, %v1439_v48, -inf }
 0xaba   :  { %1443 = vmax.xlane.f32.xlu1 %v1442_v19 }
 0xacb   :  { %1453 = vrot.lane.b32.xlu1 %v5838_v39, %s5668_s19 }
 0xacf   :  { %1677 = vrot.lane.b32.xlu1 %v5838_v39, %s5666_s3 }
 0xad3   :  { %1675 = vrot.lane.b32.xlu1 %v5838_v39, %s5667_s18 }
 0xb43   :  { %v1279_v49 = vpop.xlane.xlu0 %1278 }
 0xb44   :  { %v1280_v20 = vsub.f32 %v1274_v13, %v1279_v49 }
 0xb46   :  { %v1281_v21 = vmul.f32 1.442695, %v1280_v20 }
 0xb47   :  { %v1444_v22 = vpop.xlane.xlu1 %1443 }
 0xb48   :  { %5489 = vpow2.f32 %v1281_v21  ;;  %v1445_v23 = vsub.f32 %v1439_v48, %v1444_v22 }
 0xb4a   :  { %v1446_v24 = vmul.f32 1.442695, %v1445_v23 }
 0xb4b   :  { %v1454_v42 = vpop.permute.xlu1 %1453 }
 0xb4c   :  { %5491 = vpow2.f32 %v1446_v24 }
 0xb4f   :  { %v1678_v50 = vpop.permute.xlu1 %1677 }
 0xb52   :  { %v5490_v25 = vpop.eup %5489 }
 0xb53   :  { %v1283_v26 = vsel %vm245_vm2, %v5490_v25, 0.0 }
 0xb54   :  { %1284 = vadd.xlane.f32.xlu0 %v1283_v26 }
 0xb56   :  { %v5492_v27 = vpop.eup %5491 }
 0xb57   :  { %v1448_v28 = vsel %vm245_vm2, %v5492_v27, 0.0 }
 0xb58   :  { %1449 = vadd.xlane.f32.xlu0 %v1448_v28 }
 0xb6e   :  { %1288 = vrot.lane.b32.xlu0 %v5838_v39, %s5665_s1 }
 0xb82   :  { %v1191_v29 = vpop.f32.mrb[10].mxu1 }
 0xb83   :  { %v6004_v30 = vadd.f32 %v1191_v29, %v956_v41  ;;  %v5134_v31 = vpop.f32.mrb[11].mxu1 }
 0xb85   :  { %v2160_v13 = vadd.f32 %v4839_v10, %v6004_v30 }
 0xb87   :  { %v2162_v48 = vadd.f32 %v2160_v13, %v5821_v33 }
 0xb89   :  { %v2166_v18 = vsel %vm95_vm0, %v2162_v48, 0.0 }
 0xbe1   :  { %v1285_v32 = vpop.xlane.xlu0 %1284 }
 0xbe2   :  { %5493 = vrcp.f32 %v1285_v32 }
 0xbe5   :  { %v1450_v34 = vpop.xlane.xlu0 %1449 }
 0xbe6   :  { %5495 = vrcp.f32 %v1450_v34 }
 0xbe9   :  { %v1289_v37 = vpop.permute.xlu0 %1288 }
 0xbea   :  { %5141 = vmatpush3.msra.mxu1 %v1289_v37 }
 0xbeb   :  { %5150 = vmatprep.subr.mxu1 %v5660_v36 }
 0xbec   :  { %v5494_v38 = vpop.eup %5493 }
 0xbed   :  { %v1287_v40 = vmul.f32 %v5494_v38, %v5490_v25 }
 0xbef   :  { %5143 = vmatmul.mubr.msk.f32.vlgmr.msra.gmra.mrb[12].mxu1 %vm245_vm2, %v1287_v40 }
 0xbf0   :  { %v5496_v43 = vpop.eup %5495  ;;  %5151 = vmatpush3.msra.mxu1 %v1454_v42  ;;  %5152 = vmatprep.mubr.msk.f32.mxu1 %vm5661_vm1, %v5660_v36 }
 0xbf1   :  { %v1452_v44 = vmul.f32 %v5496_v43, %v5492_v27  ;;  %5160 = vmatprep.subr.mxu1 %v5660_v36 }
 0xbf3   :  { %5153 = vmatmul.mubr.msk.f32.vlgmr.msra.gmra.mrb[14].mxu1 %vm245_vm2, %v1452_v44 }
 0xbf4   :  { %5161 = vmatpush3.msra.mxu1 %v5902_v15  ;;  %5162 = vmatprep.mubr.msk.f32.mxu1 %vm5661_vm1, %v5660_v36  ;;  %v1676_v15 = vpop.permute.xlu1 %1675 }
 0xbf5   :  { %5170 = vmatprep.subr.mxu1 %v5660_v36 }
 0xcc2   :  { %v1360_v45 = vpop.f32.mrb[12].mxu1 }
 0xcc3   :  { %v5144_v46 = vpop.f32.mrb[13].mxu1  ;;  %5163 = vmatmul.mubr.msk.f32.vlgmr.msra.gmra.mrb[16].mxu1 %vm245_vm2, %v1360_v45 }
 0xcc4   :  { %5172 = vmatprep.mubr.msk.f32.mxu1 %vm5661_vm1, %v5660_v36 }
 0xcc6   :  { %v1525_v52 = vpop.f32.mrb[14].mxu1 }
 0xcc7   :  { %v5154_v53 = vpop.f32.mrb[15].mxu1  ;;  %5158 = vmatmul.mubr.msk.f32.vlgmr.msra.gmra.mrb[18].mxu0 %vm245_vm2, %v1525_v52 }
 0xcc8   :  { %5166 = vmatpush3.xpose.msk.msra.mxu0 %vm245_vm2, %v1678_v50  ;;  %5167 = vmatprep.mubr.msk.f32.mxu0 %vm5661_vm1, %v5660_v36 }
 0xcc9   :  { %5175 = vmatprep.subr.mxu0 %v5660_v36 }
 0xccb   :  { %5168 = vmatmul.mubr.msk.f32.vlgmr.msra.gmra.mrb[20].mxu0 %vm245_vm2, %v1676_v15 }
 0xccc   :  { %5176 = vmatpush3.msra.mxu0 %v5942_v47  ;;  %5177 = vmatprep.mubr.msk.f32.mxu0 %vm5661_vm1, %v5660_v36 }
 0xccd   :  { %5185 = vmatprep.subr.mxu0 %v5660_v36 }
 0xd96   :  { %v1671_v54 = vpop.f32.mrb[16].mxu1 }
 0xd97   :  { %v5164_v55 = vpop.f32.mrb[17].mxu1 }
 0xd9a   :  { %v1598_v56 = vpop.f32.mrb[18].mxu0 }
 0xd9b   :  { %v1672_v57 = vadd.f32 %v1671_v54, %v1598_v56  ;;  %v5159_v58 = vpop.f32.mrb[19].mxu0 }
 0xd9e   :  { %v1749_v59 = vpop.f32.mrb[20].mxu0 }
 0xd9f   :  { %v1750_v60 = vadd.f32 %v1749_v59, %v5986_v7  ;;  %v5169_v61 = vpop.f32.mrb[21].mxu0  ;;  %v4841_v59 = vld [vmem:[%s6467_s9] ss:$0 sm:$0xff] }
 0xda1   :  { %v1753_v62 = vsel %vm245_vm2, %v1750_v60, -inf }
 0xda2   :  { %1754 = vmax.xlane.f32.xlu0 %v1753_v62  ;;  %v2208_v62 = vld [vmem:[%s6468_s10] sm:$0xff] }
 0xdb8   :  { %1764 = vrot.lane.b32.xlu0 %v5838_v39, %s5671_s29 }
 0xdbc   :  { %1914 = vrot.lane.b32.xlu0 %v5838_v39, %s5670_s27 }
 0xe2f   :  { %v1755_v47 = vpop.xlane.xlu0 %1754 }
 0xe30   :  { %v1756_v63 = vsub.f32 %v1750_v60, %v1755_v47  ;;  %v2209_v47 = vld [vmem:[%s6468_s10 + $0x8] sm:$0xff] }
 0xe32   :  { %v1757_v41 = vmul.f32 1.442695, %v1756_v63  ;;  %v5394_v63 = vpack.c.bf16 %v2209_v47, %v2208_v62 }
 0xe33   :  { %v1765_v0 = vpop.permute.xlu0 %1764 }
 0xe34   :  { %5497 = vpow2.f32 %v1757_v41  ;;  %5171 = vmatpush3.msra.mxu1 %v1765_v0  ;;  %v2210_v41 = vld [vmem:[%s6468_s10 + $0x10] sm:$0xff]  ;;  %v2211_v0 = vld [vmem:[%s6468_s10 + $0x18] sm:$0xff] }
 0xe35   :  { %5180 = vmatprep.subr.mxu1 %v5660_v36 }
 0xe37   :  { %v1915_v9 = vpop.permute.xlu0 %1914 }
 0xe3e   :  { %v5498_v1 = vpop.eup %5497 }
 0xe3f   :  { %v1759_v2 = vsel %vm245_vm2, %v5498_v1, 0.0 }
 0xe40   :  { %1760 = vadd.xlane.f32.xlu1 %v1759_v2 }
 0xe51   :  { %1916 = vrot.lane.b32.xlu1 %v5838_v39, %s5669_s28 }
 0xecd   :  { %v1761_v3 = vpop.xlane.xlu1 %1760 }
 0xece   :  { %5499 = vrcp.f32 %v1761_v3 }
 0xed1   :  { %v1917_v6 = vpop.permute.xlu1 %1916 }
 0xed8   :  { %v5500_v4 = vpop.eup %5499 }
 0xed9   :  { %v1763_v5 = vmul.f32 %v5500_v4, %v5498_v1  ;;  %v5398_v1 = vpack.c.bf16 %v2211_v0, %v2210_v41 }
 0xedb   :  { %5173 = vmatmul.mubr.msk.f32.vlgmr.msra.gmra.mrb[18].mxu1 %vm245_vm2, %v1763_v5 }
 0xedc   :  { %5181 = vmatpush3.xpose.msk.msra.mxu1 %vm245_vm2, %v1917_v6  ;;  %5182 = vmatprep.mubr.msk.f32.mxu1 %vm5661_vm1, %v5660_v36 }
 0xedd   :  { %5190 = vmatprep.subr.mxu1 %v5660_v36 }
 0xedf   :  { %5183 = vmatmul.mubr.msk.f32.vlgmr.msra.gmra.mrb[20].mxu1 %vm245_vm2, %v1915_v9 }
 0xee0   :  { %5191 = vmatpush3.msra.mxu1 %v5979_v8  ;;  %5192 = vmatprep.mubr.msk.f32.mxu1 %vm5661_vm1, %v5660_v36 }
 0xfae   :  { %v1836_v11 = vpop.f32.mrb[18].mxu1 }
 0xfaf   :  { %v5174_v12 = vpop.f32.mrb[19].mxu1  ;;  %5178 = vmatmul.mubr.msk.f32.vlgmr.msra.gmra.mrb[22].mxu0 %vm245_vm2, %v1836_v11  ;;  %v2318_v11 = vld [vmem:[%s6470_s12] sm:$0xff] }
 0xfb0   :  { %5187 = vmatprep.mubr.msk.f32.mxu0 %vm5661_vm1, %v5660_v36  ;;  %v2319_v12 = vld [vmem:[%s6470_s12 + $0x8] sm:$0xff] }
 0xfb1   :  { %v5402_v13 = vpack.c.bf16 %v2319_v12, %v2318_v11 }
 0xfb2   :  { %v1988_v14 = vpop.f32.mrb[20].mxu1 }
 0xfb3   :  { %v1989_v16 = vadd.f32 %v1988_v14, %v5986_v7  ;;  %v5184_v8 = vpop.f32.mrb[21].mxu1  ;;  %5403 = vmatprep.subr.bf16.mxu1 %v5402_v13  ;;  %v2320_v14 = vld [vmem:[%s6470_s12 + $0x10] sm:$0xff] }
 0xfb5   :  { %v1992_v17 = vsel %vm245_vm2, %v1989_v16, -inf }
 0xfb6   :  { %1993 = vmax.xlane.f32.xlu1 %v1992_v17  ;;  %v2322_v17 = vld [vmem:[%s6470_s12 + $0x20] sm:$0xff] }
 0xfba   :  { %2167 = vadd.xlane.f32.xlu1 %v2166_v18 }
0x1043   :  { %v1994_v19 = vpop.xlane.xlu1 %1993 }
0x1044   :  { %v1995_v49 = vsub.f32 %v1989_v16, %v1994_v19  ;;  %v2321_v16 = vld [vmem:[%s6470_s12 + $0x18] sm:$0xff]  ;;  %v2324_v19 = vld [vmem:[%s6470_s12 + $0x30] sm:$0xff] }
0x1045   :  { %v5406_v8 = vpack.c.bf16 %v2321_v16, %v2320_v14 }
0x1046   :  { %v1996_v20 = vmul.f32 1.442695, %v1995_v49  ;;  %v2325_v49 = vld [vmem:[%s6470_s12 + $0x38] sm:$0xff] }
0x1047   :  { %v2168_v31 = vpop.xlane.xlu1 %2167 }
0x1048   :  { %5501 = vpow2.f32 %v1996_v20  ;;  %v2172_v32 = vmul.f32 0.03125, %v2168_v31  ;;  %v5414_v20 = vpack.c.bf16 %v2325_v49, %v2324_v19 }
0x104a   :  { %v2174_v38 = vsub.f32 %v2162_v48, %v2172_v32  ;;  %v2323_v48 = vld [vmem:[%s6470_s12 + $0x28] sm:$0xff] }
0x104b   :  { %v5410_v18 = vpack.c.bf16 %v2323_v48, %v2322_v17  ;;  %v4848_v17 = vld [vmem:[%s6472_s14] ss:$0 sm:$0xff] }
0x104c   :  { %v2176_v44 = vmul.f32 %v2174_v38, %v2174_v38 }
0x104e   :  { %v2178_v45 = vsel %vm95_vm0, %v2176_v44, 0.0 }
0x1052   :  { %v5502_v21 = vpop.eup %5501 }
0x1053   :  { %v1998_v22 = vsel %vm245_vm2, %v5502_v21, 0.0 }
0x1054   :  { %1999 = vadd.xlane.f32.xlu0 %v1998_v22 }
0x106a   :  { %2003 = vrot.lane.b32.xlu0 %v5838_v39, %s6478_s20 }
0x1082   :  { %v1909_v23 = vpop.f32.mrb[22].mxu0 }
0x1083   :  { %v1913_v24 = vadd.f32 %v1909_v23, %v1672_v57  ;;  %v5179_v25 = vpop.f32.mrb[23].mxu0 }
0x10e1   :  { %v2000_v26 = vpop.xlane.xlu0 %1999 }
0x10e2   :  { %5503 = vrcp.f32 %v2000_v26 }
0x10e5   :  { %v2004_v33 = vpop.permute.xlu0 %2003 }
0x10e6   :  { %5186 = vmatpush3.msra.mxu0 %v2004_v33 }
0x10e7   :  { %5395 = vmatprep.subr.bf16.mxu0 %v5394_v63 }
0x10ec   :  { %v5504_v27 = vpop.eup %5503 }
0x10ed   :  { %v2002_v28 = vmul.f32 %v5504_v27, %v5502_v21  ;;  %v4842_v21 = vld [vmem:[%s6469_s11] ss:$0 sm:$0xff] }
0x10ef   :  { %5188 = vmatmul.mubr.msk.f32.vlgmr.msra.gmra.mrb[24].mxu0 %vm245_vm2, %v2002_v28 }
0x10f0   :  { %5397 = vmatpush3.bf16.msra.mxu0 %v5394_v63 }
0x10f1   :  { %5399 = vmatprep.subr.bf16.mxu0 %v5398_v1 }
0x10f4   :  { %5401 = vmatpush3.bf16.msra.mxu0 %v5398_v1 }
0x11c2   :  { %v2075_v29 = vpop.f32.mrb[24].mxu0 }
0x11c3   :  { %v5189_v30 = vpop.f32.mrb[25].mxu0  ;;  %5193 = vmatmul.mubr.msk.f32.vlgmr.msra.gmra.mrb[22].mxu1 %vm245_vm2, %v2075_v29 }
0x11c4   :  { %5405 = vmatpush3.bf16.msra.mxu1 %v5402_v13 }
0x11c5   :  { %5407 = vmatprep.subr.bf16.mxu1 %v5406_v8 }
0x11c8   :  { %5409 = vmatpush3.bf16.msra.mxu1 %v5406_v8 }
0x11c9   :  { %5411 = vmatprep.subr.bf16.mxu1 %v5410_v18 }
0x11cc   :  { %5413 = vmatpush3.bf16.msra.mxu1 %v5410_v18  ;;  %v4849_v18 = vld [vmem:[%s6473_s15] ss:$0 sm:$0xff] }
0x11cd   :  { %5415 = vmatprep.subr.bf16.mxu1 %v5414_v20 }
0x11d0   :  { %5417 = vmatpush3.bf16.msra.mxu1 %v5414_v20 }
0x11d1   :  { %5241 = vmatprep.subr.mxu1 %v5660_v36 }
0x1296   :  { %v2148_v34 = vpop.f32.mrb[22].mxu1 }
0x1297   :  { %v2152_v37 = vadd.f32 %v2148_v34, %v1913_v24  ;;  %v5194_v39 = vpop.f32.mrb[23].mxu1 }
0x1299   :  { %v2161_v40 = vadd.f32 %v4839_v10, %v2152_v37 }
0x129b   :  { %v2163_v42 = vadd.f32 %v2161_v40, %v5825_v35  ;;  %v4840_v35 = vld [vmem:[%s6466_s8] ss:$0 sm:$0xff] }
0x129d   :  { %v2169_v43 = vsel %vm95_vm0, %v2163_v42, 0.0 }
0x129e   :  { %2170 = vadd.xlane.f32.xlu1 %v2169_v43 }
0x12a2   :  { %2179 = vadd.xlane.f32.xlu1 %v2178_v45 }
0x132b   :  { %v2171_v46 = vpop.xlane.xlu1 %2170 }
0x132c   :  { %v2173_v50 = vmul.f32 0.03125, %v2171_v46 }
0x132e   :  { %v2175_v52 = vsub.f32 %v2163_v42, %v2173_v50  ;;  %v4845_v50 = vld [vmem:[%s6471_s13] ss:$0 sm:$0xff] }
0x132f   :  { %v2180_v53 = vpop.xlane.xlu1 %2179 }
0x1330   :  { %v2184_v15 = vmul.f32 0.03125, %v2180_v53  ;;  %v2177_v54 = vmul.f32 %v2175_v52, %v2175_v52 }
0x1332   :  { %v2186_v55 = vadd.f32 1e-05, %v2184_v15  ;;  %v2181_v56 = vsel %vm95_vm0, %v2177_v54, 0.0 }
0x1333   :  { %2182 = vadd.xlane.f32.xlu1 %v2181_v56 }
0x1334   :  { %5505 = vrsqrt.f32 %v2186_v55 }
0x133e   :  { %v5506_v57 = vpop.eup %5505 }
0x133f   :  { %v2190_v58 = vmul.f32 %v5506_v57, %v2174_v38 }
0x1341   :  { %v2198_v60 = vmul.f32 %v4840_v35, %v2190_v58 }
0x1343   :  { %v6074_v61 = vadd.f32 %v4841_v59, %v2198_v60 }
0x1345   :  { %5203 = vmatprep.mubr.msk.f32.mxu0 %vm95_vm0, %v6074_v61 }
0x13c0   :  { %v2183_v2 = vpop.xlane.xlu1 %2182 }
0x13c1   :  { %v2185_v3 = vmul.f32 0.03125, %v2183_v2 }
0x13c3   :  { %v2187_v4 = vadd.f32 1e-05, %v2185_v3  ;;  %v4851_v3 = vld [vmem:[%s6462_s4 + $0x28] sm:$0xff] }
0x13c5   :  { %5507 = vrsqrt.f32 %v2187_v4 }
0x13cf   :  { %v5508_v5 = vpop.eup %5507 }
0x13d0   :  { %v2191_v6 = vmul.f32 %v5508_v5, %v2175_v52  ;;  %v4852_v5 = vld [vmem:[%s6462_s4 + $0x30] sm:$0xff] }
0x13d2   :  { %v2199_v9 = vmul.f32 %v4840_v35, %v2191_v6  ;;  %v4853_v6 = vld [vmem:[%s6462_s4 + $0x38] sm:$0xff] }
0x13d4   :  { %v2207_v10 = vadd.f32 %v4841_v59, %v2199_v9  ;;  %v5422_v9 = vpack.c.bf16 %v4853_v6, %v4852_v5 }
0x13d6   :  { %5204 = vmatmul.mubr.msk.f32.vlgmr.msra.gmra.mrb[26].mxu0 %vm95_vm0, %v2207_v10 }
0x14a9   :  { %v5205_v22 = vpop.f32.mrb[26].mxu0 }
0x14aa   :  { %v2297_v23 = vadd.f32 %v5205_v22, %v4842_v21  ;;  %v2291_v24 = vpop.f32.mrb[27].mxu0 }
0x14ab   :  { %v2292_v25 = vadd.f32 %v4842_v21, %v2291_v24  ;;  %v4855_v24 = vld [vmem:[%s6463_s5 + $0x1] ss:$0 sm:$0xff] }
0x14ac   :  { %v2301_v26 = vmul.f32 %v2297_v23, %v2297_v23 }
0x14ad   :  { %v2300_v33 = vmul.f32 %v2292_v25, %v2292_v25 }
0x14ae   :  { %v2303_v27 = vmul.f32 %v2301_v26, %v2297_v23 }
0x14af   :  { %v2302_v28 = vmul.f32 %v2300_v33, %v2292_v25 }
0x14b0   :  { %v2305_v29 = vmul.f32 0.044715, %v2303_v27 }
0x14b1   :  { %v2304_v30 = vmul.f32 0.044715, %v2302_v28 }
0x14b2   :  { %v2307_v31 = vadd.f32 %v2305_v29, %v2297_v23 }
0x14b3   :  { %v2306_v32 = vadd.f32 %v2304_v30, %v2292_v25 }
0x14b4   :  { %v2309_v34 = vmul.f32 0.7978846, %v2307_v31 }
0x14b5   :  { %v2308_v37 = vmul.f32 0.7978846, %v2306_v32 }
0x14b6   :  { %5509 = vtanh.f32 %v2309_v34 }
0x14b7   :  { %5511 = vtanh.f32 %v2308_v37 }
0x14c0   :  { %v5510_v39 = vpop.eup %5509 }
0x14c1   :  { %v5512_v38 = vpop.eup %5511  ;;  %v2313_v40 = vadd.f32 1.0, %v5510_v39 }
0x14c2   :  { %v2312_v42 = vadd.f32 1.0, %v5512_v38 }
0x14c3   :  { %v2315_v43 = vmul.f32 0.5, %v2313_v40 }
0x14c4   :  { %v2314_v44 = vmul.f32 0.5, %v2312_v42 }
0x14c5   :  { %v2317_v46 = vmul.f32 %v2315_v43, %v2297_v23 }
0x14c6   :  { %v2316_v45 = vmul.f32 %v2314_v44, %v2292_v25 }
0x14c8   :  { %5222 = vmatprep.mubr.msk.f32.mxu1 %vm2333_vm3, %v2316_v45 }
0x14c9   :  { %5223 = vmatmul.mubr.msk.f32.vlgmr.msra.gmra.mrb[24].mxu1 %vm2333_vm3, %v2317_v46 }
0x14ca   :  { %5243 = vmatprep.mubr.msk.f32.mxu1 %vm5661_vm1, %v5660_v36 }
0x159c   :  { %v5224_v52 = vpop.f32.mrb[24].mxu1 }
0x159d   :  { %v2412_v53 = vadd.f32 %v5224_v52, %v4845_v50  ;;  %v2406_v15 = vpop.f32.mrb[25].mxu1 }
0x159e   :  { %v2407_v54 = vadd.f32 %v4845_v50, %v2406_v15 }
0x159f   :  { %v2416_v55 = vadd.f32 %v2412_v53, %v2207_v10 }
0x15a0   :  { %v2415_v56 = vadd.f32 %v2407_v54, %v6074_v61  ;;  %v4850_v61 = vld [vmem:[%s6462_s4 + $0x20] sm:$0xff]  ;;  %s6482_s4 = smov 40  }
0x15a1   :  { %v2422_v57 = vsel %vm95_vm0, %v2416_v55, 0.0  ;;  %v5418_v4 = vpack.c.bf16 %v4851_v3, %v4850_v61 }
0x15a2   :  { %2423 = vadd.xlane.f32.xlu0 %v2422_v57  ;;  %v2419_v35 = vsel %vm95_vm0, %v2415_v56, 0.0 }
0x15a3   :  { %2420 = vadd.xlane.f32.xlu1 %v2419_v35  ;;  %5419 = vmatprep.subr.bf16.mxu0 %v5418_v4 }
0x15a4   :  { %5421 = vmatpush3.bf16.msra.mxu0 %v5418_v4 }
0x15a5   :  { %5423 = vmatprep.subr.bf16.mxu0 %v5422_v9 }
0x15a8   :  { %5425 = vmatpush3.bf16.msra.mxu0 %v5422_v9 }
0x15a9   :  { %5236 = vmatprep.subr.mxu0 %v5660_v36 }
0x162f   :  { %v2424_v58 = vpop.xlane.xlu0 %2423 }
0x1630   :  { %v2426_v59 = vmul.f32 0.03125, %v2424_v58  ;;  %v2421_v60 = vpop.xlane.xlu1 %2420 }
0x1631   :  { %v2425_v62 = vmul.f32 0.03125, %v2421_v60 }
0x1632   :  { %v2428_v47 = vsub.f32 %v2416_v55, %v2426_v59 }
0x1633   :  { %v2427_v63 = vsub.f32 %v2415_v56, %v2425_v62  ;;  %v6201_v56 = vld [vmem:[%s6464_s6 + $0x28] sm:$0xff] }
0x1634   :  { %v2430_v1 = vmul.f32 %v2428_v47, %v2428_v47 }
0x1635   :  { %v2429_v41 = vmul.f32 %v2427_v63, %v2427_v63 }
0x1636   :  { %v2434_v2 = vsel %vm95_vm0, %v2430_v1, 0.0 }
0x1637   :  { %v2431_v0 = vsel %vm95_vm0, %v2429_v41, 0.0  ;;  %v6216_v41 = vld [vmem:[%s6464_s6 + $0x20] sm:$0xff] }
0x1638   :  { %2432 = vadd.xlane.f32.xlu1 %v2431_v0 }
0x163c   :  { %2435 = vadd.xlane.f32.xlu1 %v2434_v2 }
0x16c5   :  { %v2433_v10 = vpop.xlane.xlu1 %2432 }
0x16c6   :  { %v2437_v11 = vmul.f32 0.03125, %v2433_v10 }
0x16c8   :  { %v2439_v12 = vadd.f32 1e-05, %v2437_v11 }
0x16c9   :  { %v2436_v13 = vpop.xlane.xlu1 %2435 }
0x16ca   :  { %5513 = vrsqrt.f32 %v2439_v12  ;;  %v2438_v14 = vmul.f32 0.03125, %v2436_v13 }
0x16cc   :  { %v2440_v16 = vadd.f32 1e-05, %v2438_v14 }
0x16ce   :  { %5515 = vrsqrt.f32 %v2440_v16 }
0x16d4   :  { %v5514_v8 = vpop.eup %5513 }
0x16d5   :  { %v2443_v48 = vmul.f32 %v5514_v8, %v2427_v63 }
0x16d7   :  { %v2451_v19 = vmul.f32 %v4848_v17, %v2443_v48 }
0x16d8   :  { %v5516_v49 = vpop.eup %5515 }
0x16d9   :  { %v2444_v20 = vmul.f32 %v5516_v49, %v2428_v47  ;;  %v6150_v21 = vadd.f32 %v4849_v18, %v2451_v19 }
0x16db   :  { %v2452_v22 = vmul.f32 %v4848_v17, %v2444_v20  ;;  %5233 = vmatprep.mubr.msk.f32.mxu0 %vm95_vm0, %v6150_v21 }
0x16dd   :  { %v6154_v23 = vadd.f32 %v4849_v18, %v2452_v22 }
0x16df   :  { %5234 = vmatmul.mubr.msk.f32.vlgmr.msra.gmra.mrb[28].mxu0 %vm95_vm0, %v6154_v23 }
0x16e0   :  { %5238 = vmatprep.mubr.msk.f32.mxu0 %vm5661_vm1, %v5660_v36 }
0x17b2   :  { %v5235_v25 = vpop.f32.mrb[28].mxu0 }
0x17b3   :  { %v6163_v26 = vadd.f32 %v5235_v25, %v4855_v24  ;;  %v2546_v33 = vpop.f32.mrb[29].mxu0 }
0x17b4   :  { %v6165_v27 = vadd.f32 %v4855_v24, %v2546_v33 }
0x17b6   :  { %2724 = vrot.lane.b32.xlu0 %v6165_v27, %s5664_s24  ;;  %2561 = vrot.lane.b32.xlu1 %v6165_v27, %s5663_s0 }
0x17ba   :  { %2726 = vrot.lane.b32.xlu1 %v6165_v27, %s5662_s30 }
0x1828   :  { %v2562_v28 = vpop.permute.xlu1 %2561  ;;  %v2725_v30 = vpop.permute.xlu0 %2724 }
0x1829   :  { %5237 = vmatpush3.xpose.msk.msra.mxu0 %vm245_vm2, %v2562_v28  ;;  %v6252_v28 = vld [vmem:[%s6464_s6 + $0x30] sm:$0xff] }
0x182a   :  { %5246 = vmatprep.subr.mxu0 %v5660_v36 }
0x182c   :  { %5239 = vmatmul.mubr.msk.f32.vlgmr.msra.gmra.mrb[30].mxu0 %vm245_vm2, %v6165_v27  ;;  %v2727_v29 = vpop.permute.xlu1 %2726 }
0x182d   :  { %5247 = vmatpush3.xpose.msk.msra.mxu0 %vm245_vm2, %v2727_v29  ;;  %5248 = vmatprep.mubr.msk.f32.mxu0 %vm5661_vm1, %v5660_v36 }
0x182e   :  { %5256 = vmatprep.subr.mxu0 %v5660_v36 }
0x1830   :  { %5249 = vmatmul.mubr.msk.f32.vlgmr.msra.gmra.mrb[32].mxu0 %vm245_vm2, %v2725_v30 }
0x1831   :  { %5258 = vmatprep.mubr.msk.f32.mxu0 %vm5661_vm1, %v5660_v36  ;;  %5257 = vmatpush3.msra.mxu0 %v6201_v56 }
0x1832   :  { %5266 = vmatprep.subr.mxu0 %v5660_v36 }
0x18ff   :  { %v2633_v31 = vpop.f32.mrb[30].mxu0 }
0x1900   :  { %v2634_v32 = vadd.f32 %v2633_v31, %v5868_v51  ;;  %v5240_v34 = vpop.f32.mrb[31].mxu0 }
0x1902   :  { %v2637_v37 = vsel %vm245_vm2, %v2634_v32, -inf }
0x1903   :  { %2638 = vmax.xlane.f32.xlu1 %v2637_v37  ;;  %v2798_v39 = vpop.f32.mrb[32].mxu0 }
0x1904   :  { %v2799_v38 = vadd.f32 %v2798_v39, %v5868_v51  ;;  %v5250_v40 = vpop.f32.mrb[33].mxu0 }
0x1906   :  { %v2802_v42 = vsel %vm245_vm2, %v2799_v38, -inf }
0x1907   :  { %2803 = vmax.xlane.f32.xlu0 %v2802_v42 }
0x191d   :  { %2813 = vrot.lane.b32.xlu0 %v6165_v27, %s5668_s19 }
0x1990   :  { %v2639_v43 = vpop.xlane.xlu1 %2638 }
0x1991   :  { %v2640_v44 = vsub.f32 %v2634_v32, %v2639_v43 }
0x1993   :  { %v2641_v45 = vmul.f32 1.442695, %v2640_v44 }
0x1994   :  { %v2804_v46 = vpop.xlane.xlu0 %2803 }
0x1995   :  { %5517 = vpow2.f32 %v2641_v45  ;;  %v2805_v50 = vsub.f32 %v2799_v38, %v2804_v46 }
0x1997   :  { %v2806_v52 = vmul.f32 1.442695, %v2805_v50 }
0x1998   :  { %v2814_v62 = vpop.permute.xlu0 %2813 }
0x1999   :  { %5519 = vpow2.f32 %v2806_v52 }
0x199f   :  { %v5518_v53 = vpop.eup %5517 }
0x19a0   :  { %v2643_v15 = vsel %vm245_vm2, %v5518_v53, 0.0 }
0x19a1   :  { %2644 = vadd.xlane.f32.xlu1 %v2643_v15 }
0x19a3   :  { %v5520_v54 = vpop.eup %5519 }
0x19a4   :  { %v2808_v55 = vsel %vm245_vm2, %v5520_v54, 0.0 }
0x19a5   :  { %2809 = vadd.xlane.f32.xlu1 %v2808_v55  ;;  %v6290_v55 = vld [vmem:[%s6464_s6 + $0x38] sm:$0xff] }
0x19b6   :  { %2648 = vrot.lane.b32.xlu1 %v6165_v27, %s5665_s1 }
0x19ba   :  { %3037 = vrot.lane.b32.xlu1 %v6165_v27, %s5666_s3 }
0x19be   :  { %3035 = vrot.lane.b32.xlu1 %v6165_v27, %s5667_s18 }
0x1a2e   :  { %v2645_v57 = vpop.xlane.xlu1 %2644 }
0x1a2f   :  { %5521 = vrcp.f32 %v2645_v57 }
0x1a32   :  { %v2810_v35 = vpop.xlane.xlu1 %2809 }
0x1a33   :  { %5523 = vrcp.f32 %v2810_v35 }
0x1a36   :  { %v2649_v58 = vpop.permute.xlu1 %2648 }
0x1a37   :  { %5242 = vmatpush3.msra.mxu1 %v2649_v58 }
0x1a38   :  { %5251 = vmatprep.subr.mxu1 %v5660_v36 }
0x1a39   :  { %v5522_v59 = vpop.eup %5521 }
0x1a3a   :  { %v2647_v60 = vmul.f32 %v5522_v59, %v5518_v53  ;;  %v3038_v2 = vpop.permute.xlu1 %3037 }
0x1a3c   :  { %5244 = vmatmul.mubr.msk.f32.vlgmr.msra.gmra.mrb[26].mxu1 %vm245_vm2, %v2647_v60 }
0x1a3d   :  { %v5524_v47 = vpop.eup %5523  ;;  %5252 = vmatpush3.msra.mxu1 %v2814_v62  ;;  %5253 = vmatprep.mubr.msk.f32.mxu1 %vm5661_vm1, %v5660_v36 }
0x1a3e   :  { %v2812_v63 = vmul.f32 %v5524_v47, %v5520_v54  ;;  %5261 = vmatprep.subr.mxu1 %v5660_v36  ;;  %v3036_v4 = vpop.permute.xlu1 %3035 }
0x1a40   :  { %5254 = vmatmul.mubr.msk.f32.vlgmr.msra.gmra.mrb[28].mxu1 %vm245_vm2, %v2812_v63 }
0x1a41   :  { %5263 = vmatprep.mubr.msk.f32.mxu1 %vm5661_vm1, %v5660_v36  ;;  %5262 = vmatpush3.msra.mxu1 %v6216_v41 }
0x1a42   :  { %5271 = vmatprep.subr.mxu1 %v5660_v36 }
0x1b0f   :  { %v2720_v0 = vpop.f32.mrb[26].mxu1 }
0x1b10   :  { %v5245_v1 = vpop.f32.mrb[27].mxu1  ;;  %5264 = vmatmul.mubr.msk.f32.vlgmr.msra.gmra.mrb[30].mxu1 %vm245_vm2, %v2720_v0 }
0x1b11   :  { %5273 = vmatprep.mubr.msk.f32.mxu1 %vm5661_vm1, %v5660_v36 }
0x1b13   :  { %v2885_v61 = vpop.f32.mrb[28].mxu1 }
0x1b14   :  { %v5255_v3 = vpop.f32.mrb[29].mxu1  ;;  %5259 = vmatmul.mubr.msk.f32.vlgmr.msra.gmra.mrb[34].mxu0 %vm245_vm2, %v2885_v61 }
0x1b15   :  { %5267 = vmatpush3.xpose.msk.msra.mxu0 %vm245_vm2, %v3038_v2  ;;  %5268 = vmatprep.mubr.msk.f32.mxu0 %vm5661_vm1, %v5660_v36 }
0x1b16   :  { %5276 = vmatprep.subr.mxu0 %v5660_v36 }
0x1b18   :  { %5269 = vmatmul.mubr.msk.f32.vlgmr.msra.gmra.mrb[36].mxu0 %vm245_vm2, %v3036_v4 }
0x1b19   :  { %5278 = vmatprep.mubr.msk.f32.mxu0 %vm5661_vm1, %v5660_v36  ;;  %5277 = vmatpush3.msra.mxu0 %v6252_v28 }
0x1b1a   :  { %5286 = vmatprep.subr.mxu0 %v5660_v36 }
0x1be3   :  { %v3031_v5 = vpop.f32.mrb[30].mxu1 }
0x1be4   :  { %v5265_v6 = vpop.f32.mrb[31].mxu1 }
0x1be7   :  { %v2958_v9 = vpop.f32.mrb[34].mxu0 }
0x1be8   :  { %v3032_v10 = vadd.f32 %v3031_v5, %v2958_v9  ;;  %v5260_v11 = vpop.f32.mrb[35].mxu0 }
0x1beb   :  { %v3109_v12 = vpop.f32.mrb[36].mxu0 }
0x1bec   :  { %v3110_v13 = vadd.f32 %v3109_v12, %v5868_v51  ;;  %v5270_v14 = vpop.f32.mrb[37].mxu0 }
0x1bee   :  { %v3113_v16 = vsel %vm245_vm2, %v3110_v13, -inf }
0x1bef   :  { %3114 = vmax.xlane.f32.xlu1 %v3113_v16 }
0x1c00   :  { %3124 = vrot.lane.b32.xlu1 %v6165_v27, %s5671_s29 }
0x1c04   :  { %3274 = vrot.lane.b32.xlu1 %v6165_v27, %s5670_s27 }
0x1c7c   :  { %v3115_v8 = vpop.xlane.xlu1 %3114 }
0x1c7d   :  { %v3116_v17 = vsub.f32 %v3110_v13, %v3115_v8 }
0x1c7f   :  { %v3117_v48 = vmul.f32 1.442695, %v3116_v17 }
0x1c80   :  { %v3125_v18 = vpop.permute.xlu1 %3124 }
0x1c81   :  { %5525 = vpow2.f32 %v3117_v48  ;;  %5272 = vmatpush3.msra.mxu1 %v3125_v18 }
0x1c82   :  { %5281 = vmatprep.subr.mxu1 %v5660_v36 }
0x1c84   :  { %v3275_v33 = vpop.permute.xlu1 %3274 }
0x1c8b   :  { %v5526_v19 = vpop.eup %5525 }
0x1c8c   :  { %v3119_v49 = vsel %vm245_vm2, %v5526_v19, 0.0 }
0x1c8d   :  { %3120 = vadd.xlane.f32.xlu0 %v3119_v49 }
0x1ca3   :  { %3276 = vrot.lane.b32.xlu0 %v6165_v27, %s5669_s28 }
0x1d1a   :  { %v3121_v20 = vpop.xlane.xlu0 %3120 }
0x1d1b   :  { %5527 = vrcp.f32 %v3121_v20 }
0x1d1e   :  { %v3277_v25 = vpop.permute.xlu0 %3276 }
0x1d25   :  { %v5528_v22 = vpop.eup %5527 }
0x1d26   :  { %v3123_v24 = vmul.f32 %v5528_v22, %v5526_v19 }
0x1d28   :  { %5274 = vmatmul.mubr.msk.f32.vlgmr.msra.gmra.mrb[32].mxu1 %vm245_vm2, %v3123_v24 }
0x1d29   :  { %5282 = vmatpush3.xpose.msk.msra.mxu1 %vm245_vm2, %v3277_v25  ;;  %5283 = vmatprep.mubr.msk.f32.mxu1 %vm5661_vm1, %v5660_v36 }
0x1d2a   :  { %5291 = vmatprep.subr.mxu1 %v5660_v36 }
0x1d2c   :  { %5284 = vmatmul.mubr.msk.f32.vlgmr.msra.gmra.mrb[34].mxu1 %vm245_vm2, %v3275_v33 }
0x1d2d   :  { %5293 = vmatprep.mubr.msk.f32.mxu1 %vm5661_vm1, %v5660_v36  ;;  %5292 = vmatpush3.msra.mxu1 %v6290_v55 }
0x1d2e   :  { %5301 = vmatprep.subr.mxu1 %v5660_v36 }
0x1dfb   :  { %v3196_v29 = vpop.f32.mrb[32].mxu1 }
0x1dfc   :  { %v5275_v30 = vpop.f32.mrb[33].mxu1  ;;  %5279 = vmatmul.mubr.msk.f32.vlgmr.msra.gmra.mrb[38].mxu0 %vm245_vm2, %v3196_v29 }
0x1dfd   :  { %5288 = vmatprep.mubr.msk.f32.mxu0 %vm5661_vm1, %v5660_v36 }
0x1dff   :  { %v3348_v31 = vpop.f32.mrb[34].mxu1 }
0x1e00   :  { %v3349_v32 = vadd.f32 %v3348_v31, %v5868_v51  ;;  %v5285_v34 = vpop.f32.mrb[35].mxu1 }
0x1e02   :  { %v3352_v37 = vsel %vm245_vm2, %v3349_v32, -inf }
0x1e03   :  { %3353 = vmax.xlane.f32.xlu1 %v3352_v37 }
0x1e14   :  { %3514 = vrot.lane.b32.xlu1 %v6163_v26, %s5663_s0 }
0x1e18   :  { %3679 = vrot.lane.b32.xlu1 %v6163_v26, %s5662_s30 }
0x1e90   :  { %v3354_v39 = vpop.xlane.xlu1 %3353 }
0x1e91   :  { %v3355_v38 = vsub.f32 %v3349_v32, %v3354_v39 }
0x1e93   :  { %v3356_v40 = vmul.f32 1.442695, %v3355_v38 }
0x1e94   :  { %v3515_v53 = vpop.permute.xlu1 %3514 }
0x1e95   :  { %5529 = vpow2.f32 %v3356_v40 }
0x1e9f   :  { %v5530_v42 = vpop.eup %5529 }
0x1ea0   :  { %v3358_v43 = vsel %vm245_vm2, %v5530_v42, 0.0 }
0x1ea1   :  { %3359 = vadd.xlane.f32.xlu0 %v3358_v43 }
0x1eb7   :  { %3363 = vrot.lane.b32.xlu0 %v6165_v27, %s6482_s4  ;;  %v3680_v27 = vpop.permute.xlu1 %3679 }
0x1ebb   :  { %3677 = vrot.lane.b32.xlu0 %v6163_v26, %s5664_s24 }
0x1ecf   :  { %v3269_v51 = vpop.f32.mrb[38].mxu0 }
0x1ed0   :  { %v3273_v44 = vadd.f32 %v3269_v51, %v3032_v10  ;;  %v5280_v45 = vpop.f32.mrb[39].mxu0 }
0x1f2e   :  { %v3360_v46 = vpop.xlane.xlu0 %3359 }
0x1f2f   :  { %5531 = vrcp.f32 %v3360_v46 }
0x1f32   :  { %v3364_v50 = vpop.permute.xlu0 %3363 }
0x1f33   :  { %5287 = vmatpush3.msra.mxu0 %v3364_v50 }
0x1f34   :  { %5296 = vmatprep.subr.mxu0 %v5660_v36 }
0x1f36   :  { %v3678_v54 = vpop.permute.xlu0 %3677 }
0x1f39   :  { %v5532_v52 = vpop.eup %5531 }
0x1f3a   :  { %v3362_v15 = vmul.f32 %v5532_v52, %v5530_v42 }
0x1f3c   :  { %5289 = vmatmul.mubr.msk.f32.vlgmr.msra.gmra.mrb[40].mxu0 %vm245_vm2, %v3362_v15 }
0x1f3d   :  { %5297 = vmatpush3.xpose.msk.msra.mxu0 %vm245_vm2, %v3515_v53  ;;  %5298 = vmatprep.mubr.msk.f32.mxu0 %vm5661_vm1, %v5660_v36 }
0x1f3e   :  { %5306 = vmatprep.subr.mxu0 %v5660_v36 }
0x1f40   :  { %5299 = vmatmul.mubr.msk.f32.vlgmr.msra.gmra.mrb[42].mxu0 %vm245_vm2, %v6163_v26 }
0x1f41   :  { %5307 = vmatpush3.xpose.msk.msra.mxu0 %vm245_vm2, %v3680_v27  ;;  %5308 = vmatprep.mubr.msk.f32.mxu0 %vm5661_vm1, %v5660_v36 }
0x1f42   :  { %5316 = vmatprep.subr.mxu0 %v5660_v36 }
0x1f44   :  { %5309 = vmatmul.mubr.msk.f32.vlgmr.msra.gmra.mrb[44].mxu0 %vm245_vm2, %v3678_v54 }
0x1f45   :  { %5317 = vmatpush3.msra.mxu0 %v6201_v56  ;;  %5318 = vmatprep.mubr.msk.f32.mxu0 %vm5661_vm1, %v5660_v36 }
0x1f46   :  { %5326 = vmatprep.subr.mxu0 %v5660_v36 }
0x200f   :  { %v3435_v57 = vpop.f32.mrb[40].mxu0 }
0x2010   :  { %v5290_v35 = vpop.f32.mrb[41].mxu0  ;;  %5294 = vmatmul.mubr.msk.f32.vlgmr.msra.gmra.mrb[36].mxu1 %vm245_vm2, %v3435_v57 }
0x2011   :  { %5303 = vmatprep.mubr.msk.f32.mxu1 %vm5661_vm1, %v5660_v36 }
0x2013   :  { %v3586_v56 = vpop.f32.mrb[42].mxu0 }
0x2014   :  { %v3587_v58 = vadd.f32 %v3586_v56, %v5986_v7  ;;  %v5300_v59 = vpop.f32.mrb[43].mxu0 }
0x2016   :  { %v3590_v60 = vsel %vm245_vm2, %v3587_v58, -inf }
0x2017   :  { %3591 = vmax.xlane.f32.xlu1 %v3590_v60  ;;  %v3751_v62 = vpop.f32.mrb[44].mxu0 }
0x2018   :  { %v3752_v47 = vadd.f32 %v3751_v62, %v5986_v7  ;;  %v5310_v63 = vpop.f32.mrb[45].mxu0 }
0x201a   :  { %v3755_v0 = vsel %vm245_vm2, %v3752_v47, -inf }
0x201b   :  { %3756 = vmax.xlane.f32.xlu0 %v3755_v0 }
0x20a4   :  { %v3592_v1 = vpop.xlane.xlu1 %3591 }
0x20a5   :  { %v3593_v2 = vsub.f32 %v3587_v58, %v3592_v1 }
0x20a7   :  { %v3594_v61 = vmul.f32 1.442695, %v3593_v2 }
0x20a8   :  { %v3757_v3 = vpop.xlane.xlu0 %3756 }
0x20a9   :  { %5533 = vpow2.f32 %v3594_v61  ;;  %v3758_v4 = vsub.f32 %v3752_v47, %v3757_v3 }
0x20ab   :  { %v3759_v5 = vmul.f32 1.442695, %v3758_v4 }
0x20ad   :  { %5535 = vpow2.f32 %v3759_v5 }
0x20b3   :  { %v5534_v6 = vpop.eup %5533 }
0x20b4   :  { %v3596_v9 = vsel %vm245_vm2, %v5534_v6, 0.0 }
0x20b5   :  { %3597 = vadd.xlane.f32.xlu0 %v3596_v9 }
0x20b7   :  { %v5536_v10 = vpop.eup %5535 }
0x20b8   :  { %v3761_v11 = vsel %vm245_vm2, %v5536_v10, 0.0 }
0x20b9   :  { %3762 = vadd.xlane.f32.xlu1 %v3761_v11 }
0x20ca   :  { %3766 = vrot.lane.b32.xlu1 %v6163_v26, %s5668_s19 }
0x20cb   :  { %3601 = vrot.lane.b32.xlu0 %v6163_v26, %s5665_s1 }
0x20ce   :  { %3990 = vrot.lane.b32.xlu1 %v6163_v26, %s5666_s3 }
0x20cf   :  { %3988 = vrot.lane.b32.xlu0 %v6163_v26, %s5667_s18 }
0x20e3   :  { %v3508_v12 = vpop.f32.mrb[36].mxu1 }
0x20e4   :  { %v6311_v13 = vadd.f32 %v3508_v12, %v3273_v44  ;;  %v5295_v14 = vpop.f32.mrb[37].mxu1 }
0x2142   :  { %v3598_v16 = vpop.xlane.xlu0 %3597 }
0x2143   :  { %5537 = vrcp.f32 %v3598_v16 }
0x2146   :  { %v3763_v8 = vpop.xlane.xlu1 %3762  ;;  %v3602_v17 = vpop.permute.xlu0 %3601 }
0x2147   :  { %5539 = vrcp.f32 %v3763_v8  ;;  %5302 = vmatpush3.msra.mxu1 %v3602_v17 }
0x2148   :  { %5311 = vmatprep.subr.mxu1 %v5660_v36 }
0x214a   :  { %v3767_v19 = vpop.permute.xlu1 %3766 }
0x214d   :  { %v5538_v48 = vpop.eup %5537 }
0x214e   :  { %v3600_v18 = vmul.f32 %v5538_v48, %v5534_v6  ;;  %v3991_v33 = vpop.permute.xlu1 %3990 }
0x2150   :  { %5304 = vmatmul.mubr.msk.f32.vlgmr.msra.gmra.mrb[38].mxu1 %vm245_vm2, %v3600_v18 }
0x2151   :  { %v5540_v49 = vpop.eup %5539  ;;  %5312 = vmatpush3.msra.mxu1 %v3767_v19  ;;  %5313 = vmatprep.mubr.msk.f32.mxu1 %vm5661_vm1, %v5660_v36 }
0x2152   :  { %v3765_v20 = vmul.f32 %v5540_v49, %v5536_v10  ;;  %5321 = vmatprep.subr.mxu1 %v5660_v36 }
0x2154   :  { %5314 = vmatmul.mubr.msk.f32.vlgmr.msra.gmra.mrb[40].mxu1 %vm245_vm2, %v3765_v20 }
0x2155   :  { %5322 = vmatpush3.msra.mxu1 %v6216_v41  ;;  %5323 = vmatprep.mubr.msk.f32.mxu1 %vm5661_vm1, %v5660_v36  ;;  %v3989_v41 = vpop.permute.xlu0 %3988 }
0x2156   :  { %5331 = vmatprep.subr.mxu1 %v5660_v36 }
0x2223   :  { %v3673_v22 = vpop.f32.mrb[38].mxu1 }
0x2224   :  { %v5305_v24 = vpop.f32.mrb[39].mxu1  ;;  %5324 = vmatmul.mubr.msk.f32.vlgmr.msra.gmra.mrb[42].mxu1 %vm245_vm2, %v3673_v22 }
0x2225   :  { %5333 = vmatprep.mubr.msk.f32.mxu1 %vm5661_vm1, %v5660_v36 }
0x2227   :  { %v3838_v25 = vpop.f32.mrb[40].mxu1 }
0x2228   :  { %v5315_v29 = vpop.f32.mrb[41].mxu1  ;;  %5319 = vmatmul.mubr.msk.f32.vlgmr.msra.gmra.mrb[46].mxu0 %vm245_vm2, %v3838_v25 }
0x2229   :  { %5327 = vmatpush3.xpose.msk.msra.mxu0 %vm245_vm2, %v3991_v33  ;;  %5328 = vmatprep.mubr.msk.f32.mxu0 %vm5661_vm1, %v5660_v36 }
0x222a   :  { %5336 = vmatprep.subr.mxu0 %v5660_v36 }
0x222c   :  { %5329 = vmatmul.mubr.msk.f32.vlgmr.msra.gmra.mrb[48].mxu0 %vm245_vm2, %v3989_v41 }
0x222d   :  { %5337 = vmatpush3.msra.mxu0 %v6252_v28  ;;  %5338 = vmatprep.mubr.msk.f32.mxu0 %vm5661_vm1, %v5660_v36 }
0x222e   :  { %5346 = vmatprep.subr.mxu0 %v5660_v36 }
0x22f7   :  { %v3984_v30 = vpop.f32.mrb[42].mxu1 }
0x22f8   :  { %v5325_v31 = vpop.f32.mrb[43].mxu1 }
0x22fb   :  { %v3911_v32 = vpop.f32.mrb[46].mxu0 }
0x22fc   :  { %v3985_v34 = vadd.f32 %v3984_v30, %v3911_v32  ;;  %v5320_v37 = vpop.f32.mrb[47].mxu0  ;;  %v4899_v32 = vld [vmem:[%s6467_s9 + $0x1] ss:$0 sm:$0xff] }
0x22ff   :  { %v4062_v39 = vpop.f32.mrb[48].mxu0 }
0x2300   :  { %v4063_v38 = vadd.f32 %v4062_v39, %v5986_v7  ;;  %v5330_v40 = vpop.f32.mrb[49].mxu0  ;;  %v4900_v39 = vld [vmem:[%s6468_s10 + $0x20] sm:$0xff] }
0x2302   :  { %v4066_v42 = vsel %vm245_vm2, %v4063_v38, -inf }
0x2303   :  { %4067 = vmax.xlane.f32.xlu1 %v4066_v42  ;;  %v4902_v42 = vld [vmem:[%s6468_s10 + $0x30] sm:$0xff] }
0x2314   :  { %4229 = vrot.lane.b32.xlu1 %v6163_v26, %s5669_s28 }
0x2318   :  { %4227 = vrot.lane.b32.xlu1 %v6163_v26, %s5670_s27 }
0x2390   :  { %v4068_v28 = vpop.xlane.xlu1 %4067 }
0x2391   :  { %v4069_v43 = vsub.f32 %v4063_v38, %v4068_v28  ;;  %v4901_v38 = vld [vmem:[%s6468_s10 + $0x28] sm:$0xff]  ;;  %v4903_v28 = vld [vmem:[%s6468_s10 + $0x38] sm:$0xff] }
0x2392   :  { %v5426_v40 = vpack.c.bf16 %v4901_v38, %v4900_v39 }
0x2393   :  { %v4070_v51 = vmul.f32 1.442695, %v4069_v43  ;;  %v5430_v43 = vpack.c.bf16 %v4903_v28, %v4902_v42 }
0x2394   :  { %v4230_v53 = vpop.permute.xlu1 %4229 }
0x2395   :  { %5541 = vpow2.f32 %v4070_v51 }
0x2398   :  { %v4228_v27 = vpop.permute.xlu1 %4227 }
0x239f   :  { %v5542_v44 = vpop.eup %5541 }
0x23a0   :  { %v4072_v45 = vsel %vm245_vm2, %v5542_v44, 0.0 }
0x23a1   :  { %4073 = vadd.xlane.f32.xlu0 %v4072_v45 }
0x23b7   :  { %4077 = vrot.lane.b32.xlu0 %v6163_v26, %s5671_s29 }
0x242e   :  { %v4074_v46 = vpop.xlane.xlu0 %4073 }
0x242f   :  { %5543 = vrcp.f32 %v4074_v46 }
0x2432   :  { %v4078_v50 = vpop.permute.xlu0 %4077 }
0x2433   :  { %5332 = vmatpush3.msra.mxu1 %v4078_v50 }
0x2434   :  { %5341 = vmatprep.subr.mxu1 %v5660_v36 }
0x2439   :  { %v5544_v52 = vpop.eup %5543 }
0x243a   :  { %v4076_v15 = vmul.f32 %v5544_v52, %v5542_v44 }
0x243c   :  { %5334 = vmatmul.mubr.msk.f32.vlgmr.msra.gmra.mrb[44].mxu1 %vm245_vm2, %v4076_v15  ;;  %v4908_v15 = vld [vmem:[%s6470_s12 + $0x40] sm:$0xff] }
0x243d   :  { %5342 = vmatpush3.xpose.msk.msra.mxu1 %vm245_vm2, %v4230_v53  ;;  %5343 = vmatprep.mubr.msk.f32.mxu1 %vm5661_vm1, %v5660_v36 }
0x243e   :  { %5351 = vmatprep.subr.mxu1 %v5660_v36 }
0x2440   :  { %5344 = vmatmul.mubr.msk.f32.vlgmr.msra.gmra.mrb[46].mxu1 %vm245_vm2, %v4228_v27  ;;  %v4909_v27 = vld [vmem:[%s6470_s12 + $0x48] sm:$0xff] }
0x2441   :  { %5352 = vmatpush3.msra.mxu1 %v6290_v55  ;;  %5353 = vmatprep.mubr.msk.f32.mxu1 %vm5661_vm1, %v5660_v36 }
0x250f   :  { %v4149_v54 = vpop.f32.mrb[44].mxu1 }
0x2510   :  { %v5335_v57 = vpop.f32.mrb[45].mxu1  ;;  %5339 = vmatmul.mubr.msk.f32.vlgmr.msra.gmra.mrb[50].mxu0 %vm245_vm2, %v4149_v54  ;;  %v5434_v54 = vpack.c.bf16 %v4909_v27, %v4908_v15 }
0x2511   :  { %5348 = vmatprep.mubr.msk.f32.mxu0 %vm5661_vm1, %v5660_v36  ;;  %v4895_v36 = vld [vmem:[%s6465_s7 + $0x1] ss:$0 sm:$0xff]  ;;  %v4910_v57 = vld [vmem:[%s6470_s12 + $0x50] sm:$0xff] }
0x2512   :  { %v4474_v63 = vadd.f32 %v4895_v36, %v6311_v13  ;;  %5435 = vmatprep.subr.bf16.mxu1 %v5434_v54 }
0x2513   :  { %v4301_v35 = vpop.f32.mrb[46].mxu1 }
0x2514   :  { %v4302_v56 = vadd.f32 %v4301_v35, %v5986_v7  ;;  %v5345_v58 = vpop.f32.mrb[47].mxu1  ;;  %v4476_v1 = vadd.f32 %v4474_v63, %v6150_v21  ;;  %v4911_v35 = vld [vmem:[%s6470_s12 + $0x58] sm:$0xff] }
0x2515   :  { %v4912_v58 = vld [vmem:[%s6470_s12 + $0x60] sm:$0xff] }
0x2516   :  { %v4305_v59 = vsel %vm245_vm2, %v4302_v56, -inf }
0x2517   :  { %4306 = vmax.xlane.f32.xlu0 %v4305_v59  ;;  %v4913_v59 = vld [vmem:[%s6470_s12 + $0x68] sm:$0xff] }
0x252d   :  { %4316 = vrot.lane.b32.xlu0 %v6163_v26, %s6482_s4  ;;  %v4482_v26 = vsel %vm95_vm0, %v4476_v1, 0.0 }
0x25a4   :  { %v4307_v55 = vpop.xlane.xlu0 %4306 }
0x25a5   :  { %v4308_v60 = vsub.f32 %v4302_v56, %v4307_v55  ;;  %v5438_v56 = vpack.c.bf16 %v4911_v35, %v4910_v57  ;;  %v5442_v55 = vpack.c.bf16 %v4913_v59, %v4912_v58 }
0x25a7   :  { %v4309_v62 = vmul.f32 1.442695, %v4308_v60  ;;  %v4914_v60 = vld [vmem:[%s6470_s12 + $0x70] sm:$0xff] }
0x25a8   :  { %v4317_v47 = vpop.permute.xlu0 %4316 }
0x25a9   :  { %5545 = vpow2.f32 %v4309_v62  ;;  %5347 = vmatpush3.msra.mxu0 %v4317_v47  ;;  %v4915_v62 = vld [vmem:[%s6470_s12 + $0x78] sm:$0xff] }
0x25aa   :  { %5427 = vmatprep.subr.bf16.mxu0 %v5426_v40  ;;  %v5446_v47 = vpack.c.bf16 %v4915_v62, %v4914_v60 }
0x25b3   :  { %v5546_v7 = vpop.eup %5545 }
0x25b4   :  { %v4311_v0 = vsel %vm245_vm2, %v5546_v7, 0.0 }
0x25b5   :  { %4312 = vadd.xlane.f32.xlu1 %v4311_v0 }
0x25b9   :  { %4483 = vadd.xlane.f32.xlu1 %v4482_v26 }
0x25e3   :  { %v4222_v2 = vpop.f32.mrb[50].mxu0 }
0x25e4   :  { %v4226_v61 = vadd.f32 %v4222_v2, %v3985_v34  ;;  %v5340_v3 = vpop.f32.mrb[51].mxu0 }
0x2642   :  { %v4313_v4 = vpop.xlane.xlu1 %4312 }
0x2643   :  { %5547 = vrcp.f32 %v4313_v4 }
0x2646   :  { %v4484_v11 = vpop.xlane.xlu1 %4483 }
0x2647   :  { %v4488_v12 = vmul.f32 0.03125, %v4484_v11 }
0x2649   :  { %v4490_v16 = vsub.f32 %v4476_v1, %v4488_v12 }
0x264b   :  { %v4492_v18 = vmul.f32 %v4490_v16, %v4490_v16 }
0x264d   :  { %v5548_v5 = vpop.eup %5547  ;;  %v4494_v19 = vsel %vm95_vm0, %v4492_v18, 0.0  ;;  %v4917_v18 = vld [vmem:[%s6471_s13 + $0x1] ss:$0 sm:$0xff] }
0x264e   :  { %v4315_v6 = vmul.f32 %v5548_v5, %v5546_v7 }
0x2650   :  { %5349 = vmatmul.mubr.msk.f32.vlgmr.msra.gmra.mrb[52].mxu0 %vm245_vm2, %v4315_v6 }
0x2651   :  { %5429 = vmatpush3.bf16.msra.mxu0 %v5426_v40 }
0x2652   :  { %5431 = vmatprep.subr.bf16.mxu0 %v5430_v43 }
0x2655   :  { %5433 = vmatpush3.bf16.msra.mxu0 %v5430_v43 }
0x2723   :  { %v4388_v9 = vpop.f32.mrb[52].mxu0 }
0x2724   :  { %v5350_v10 = vpop.f32.mrb[53].mxu0  ;;  %5354 = vmatmul.mubr.msk.f32.vlgmr.msra.gmra.mrb[48].mxu1 %vm245_vm2, %v4388_v9 }
0x2725   :  { %5437 = vmatpush3.bf16.msra.mxu1 %v5434_v54 }
0x2726   :  { %5439 = vmatprep.subr.bf16.mxu1 %v5438_v56 }
0x2729   :  { %5441 = vmatpush3.bf16.msra.mxu1 %v5438_v56 }
0x272a   :  { %5443 = vmatprep.subr.bf16.mxu1 %v5442_v55 }
0x272d   :  { %5445 = vmatpush3.bf16.msra.mxu1 %v5442_v55 }
0x272e   :  { %5447 = vmatprep.subr.bf16.mxu1 %v5446_v47 }
0x2731   :  { %5449 = vmatpush3.bf16.msra.mxu1 %v5446_v47 }
0x27f7   :  { %v4461_v21 = vpop.f32.mrb[48].mxu1 }
0x27f8   :  { %v4465_v13 = vadd.f32 %v4461_v21, %v4226_v61  ;;  %v5355_v14 = vpop.f32.mrb[49].mxu1 }
0x27fa   :  { %v4475_v8 = vadd.f32 %v4895_v36, %v4465_v13  ;;  %v4905_v36 = vld [vmem:[%s6469_s11 + $0x1] ss:$0 sm:$0xff] }
0x27fc   :  { %v4477_v17 = vadd.f32 %v4475_v8, %v6154_v23  ;;  %v4898_v23 = vld [vmem:[%s6466_s8 + $0x1] ss:$0 sm:$0xff]  ;;  %s5673_s8 = smov [#allocation8]  }
0x27fd   :  { %s4789_s23 = sshll.u32 %s5673_s8, 4  ;;  %s4790_s23 = int_to_ptr.vmem [resolvable:$true] %s4789_s23 }
0x27fe   :  { %v4485_v48 = vsel %vm95_vm0, %v4477_v17, 0.0  ;;  %s5627_s9 = scalar_lea.vmem %s4790_s23, 256  ;;  %p5632_p11 = scmp.lt.s32.totalorder %s4790_s23, %s4790_s23 }
0x27ff   :  { %4486 = vadd.xlane.f32.xlu1 %v4485_v48  ;;  %p5628_p10 = scmp.ne.s32.totalorder %s4790_s23, %s5627_s9  ;;  %p5633_p12 = scmp.lt.s32.totalorder %s5627_s9, %s5627_s9 }
0x2801   :  { %p5634_p13 = por %p5633_p12, %p5632_p11 }
0x2803   :  { %4495 = vadd.xlane.f32.xlu1 %v4494_v19  ;;  %p5635_p0 = pnand %p5634_p13, %p5628_p10 }
0x288c   :  { %v4487_v49 = vpop.xlane.xlu1 %4486 }
0x288d   :  { %v4489_v20 = vmul.f32 0.03125, %v4487_v49 }
0x288f   :  { %v4491_v22 = vsub.f32 %v4477_v17, %v4489_v20 }
0x2890   :  { %v4496_v24 = vpop.xlane.xlu1 %4495 }
0x2891   :  { %v4500_v25 = vmul.f32 0.03125, %v4496_v24  ;;  %v4493_v33 = vmul.f32 %v4491_v22, %v4491_v22 }
0x2893   :  { %v4502_v29 = vadd.f32 1e-05, %v4500_v25  ;;  %v4497_v41 = vsel %vm95_vm0, %v4493_v33, 0.0 }
0x2894   :  { %4498 = vadd.xlane.f32.xlu1 %v4497_v41 }
0x2895   :  { %5549 = vrsqrt.f32 %v4502_v29 }
0x289f   :  { %v5550_v30 = vpop.eup %5549 }
0x28a0   :  { %v4506_v31 = vmul.f32 %v5550_v30, %v4490_v16 }
0x28a2   :  { %v4514_v34 = vmul.f32 %v4898_v23, %v4506_v31 }
0x28a4   :  { %v6381_v37 = vadd.f32 %v4899_v32, %v4514_v34 }
0x28a6   :  { %5364 = vmatprep.mubr.msk.f32.mxu0 %vm95_vm0, %v6381_v37 }
0x2921   :  { %v4499_v51 = vpop.xlane.xlu1 %4498 }
0x2922   :  { %v4501_v44 = vmul.f32 0.03125, %v4499_v51 }
0x2924   :  { %v4503_v45 = vadd.f32 1e-05, %v4501_v44 }
0x2926   :  { %5551 = vrsqrt.f32 %v4503_v45 }
0x2930   :  { %v5552_v46 = vpop.eup %5551 }
0x2931   :  { %v4507_v50 = vmul.f32 %v5552_v46, %v4491_v22 }
0x2933   :  { %v4515_v52 = vmul.f32 %v4898_v23, %v4507_v50  ;;  %v4922_v50 = vld [vmem:[%s6472_s14 + $0x1] ss:$0 sm:$0xff] }
0x2935   :  { %v4523_v53 = vadd.f32 %v4899_v32, %v4515_v52 }
0x2937   :  { %5365 = vmatmul.mubr.msk.f32.vlgmr.msra.gmra.mrb[54].mxu0 %vm95_vm0, %v4523_v53 }
0x2a0a   :  { %v5366_v63 = vpop.f32.mrb[54].mxu0 }
0x2a0b   :  { %v4615_v7 = vadd.f32 %v5366_v63, %v4905_v36  ;;  %v4609_v0 = vpop.f32.mrb[55].mxu0 }
0x2a0c   :  { %v4610_v1 = vadd.f32 %v4905_v36, %v4609_v0 }
0x2a0d   :  { %v4619_v26 = vmul.f32 %v4615_v7, %v4615_v7 }
0x2a0e   :  { %v4618_v2 = vmul.f32 %v4610_v1, %v4610_v1 }
0x2a0f   :  { %v4621_v61 = vmul.f32 %v4619_v26, %v4615_v7 }
0x2a10   :  { %v4620_v3 = vmul.f32 %v4618_v2, %v4610_v1 }
0x2a11   :  { %v4623_v4 = vmul.f32 0.044715, %v4621_v61 }
0x2a12   :  { %v4622_v5 = vmul.f32 0.044715, %v4620_v3 }
0x2a13   :  { %v4625_v6 = vadd.f32 %v4623_v4, %v4615_v7 }
0x2a14   :  { %v4624_v9 = vadd.f32 %v4622_v5, %v4610_v1 }
0x2a15   :  { %v4627_v10 = vmul.f32 0.7978846, %v4625_v6 }
0x2a16   :  { %v4626_v11 = vmul.f32 0.7978846, %v4624_v9 }
0x2a17   :  { %5553 = vtanh.f32 %v4627_v10 }
0x2a18   :  { %5555 = vtanh.f32 %v4626_v11 }
0x2a21   :  { %v5554_v12 = vpop.eup %5553 }
0x2a22   :  { %v5556_v21 = vpop.eup %5555  ;;  %v4631_v13 = vadd.f32 1.0, %v5554_v12 }
0x2a23   :  { %v4630_v14 = vadd.f32 1.0, %v5556_v21 }
0x2a24   :  { %v4633_v16 = vmul.f32 0.5, %v4631_v13 }
0x2a25   :  { %v4632_v8 = vmul.f32 0.5, %v4630_v14 }
0x2a26   :  { %v4635_v48 = vmul.f32 %v4633_v16, %v4615_v7 }
0x2a27   :  { %v4634_v17 = vmul.f32 %v4632_v8, %v4610_v1 }
0x2a29   :  { %5383 = vmatprep.mubr.msk.f32.mxu1 %vm2333_vm3, %v4634_v17 }
0x2a2a   :  { %5384 = vmatmul.mubr.msk.f32.vlgmr.msra.gmra.mrb[50].mxu1 %vm2333_vm3, %v4635_v48 }
0x2afd   :  { %v5385_v19 = vpop.f32.mrb[50].mxu1 }
0x2afe   :  { %v4731_v49 = vadd.f32 %v5385_v19, %v4917_v18  ;;  %v4725_v20 = vpop.f32.mrb[51].mxu1 }
0x2aff   :  { %v4726_v22 = vadd.f32 %v4917_v18, %v4725_v20 }
0x2b00   :  { %v4735_v24 = vadd.f32 %v4731_v49, %v4523_v53  ;;  %v4923_v53 = vld [vmem:[%s6473_s15 + $0x1] ss:$0 sm:$0xff] }
0x2b01   :  { %v4734_v25 = vadd.f32 %v4726_v22, %v6381_v37 }
0x2b02   :  { %v4743_v33 = vsel %vm95_vm0, %v4735_v24, 0.0 }
0x2b03   :  { %4744 = vadd.xlane.f32.xlu1 %v4743_v33  ;;  %v4740_v29 = vsel %vm95_vm0, %v4734_v25, 0.0 }
0x2b04   :  { %4741 = vadd.xlane.f32.xlu0 %v4740_v29 }
0x2b90   :  { %v4745_v41 = vpop.xlane.xlu1 %4744 }
0x2b91   :  { %v4747_v30 = vmul.f32 0.03125, %v4745_v41  ;;  %v4742_v23 = vpop.xlane.xlu0 %4741 }
0x2b92   :  { %v4746_v31 = vmul.f32 0.03125, %v4742_v23 }
0x2b93   :  { %v4749_v32 = vsub.f32 %v4735_v24, %v4747_v30 }
0x2b94   :  { %v4748_v34 = vsub.f32 %v4734_v25, %v4746_v31 }
0x2b95   :  { %v4751_v40 = vmul.f32 %v4749_v32, %v4749_v32 }
0x2b96   :  { %v4750_v39 = vmul.f32 %v4748_v34, %v4748_v34 }
0x2b97   :  { %v4755_v42 = vsel %vm95_vm0, %v4751_v40, 0.0 }
0x2b98   :  { %v4752_v38 = vsel %vm95_vm0, %v4750_v39, 0.0 }
0x2b99   :  { %4753 = vadd.xlane.f32.xlu1 %v4752_v38 }
0x2b9d   :  { %4756 = vadd.xlane.f32.xlu1 %v4755_v42 }
0x2c26   :  { %v4754_v37 = vpop.xlane.xlu1 %4753 }
0x2c27   :  { %v4758_v28 = vmul.f32 0.03125, %v4754_v37 }
0x2c29   :  { %v4760_v43 = vadd.f32 1e-05, %v4758_v28 }
0x2c2a   :  { %v4757_v51 = vpop.xlane.xlu1 %4756 }
0x2c2b   :  { %5557 = vrsqrt.f32 %v4760_v43  ;;  %v4759_v44 = vmul.f32 0.03125, %v4757_v51 }
0x2c2d   :  { %v4761_v45 = vadd.f32 1e-05, %v4759_v44 }
0x2c2f   :  { %5559 = vrsqrt.f32 %v4761_v45 }
0x2c35   :  { %v5558_v46 = vpop.eup %5557 }
0x2c36   :  { %v4764_v52 = vmul.f32 %v5558_v46, %v4748_v34 }
0x2c38   :  { %v4772_v15 = vmul.f32 %v4922_v50, %v4764_v52 }
0x2c39   :  { %v5560_v27 = vpop.eup %5559 }
0x2c3a   :  { %v4765_v54 = vmul.f32 %v5560_v27, %v4749_v32  ;;  %v4780_v57 = vadd.f32 %v4923_v53, %v4772_v15 }
0x2c3c   :  { %v4773_v35 = vmul.f32 %v4922_v50, %v4765_v54  ;;  %4782 = vst.msk [vmem:[#allocation8] sm:$0xff] %vm95_vm0, %v4780_v57 }
0x2c3e   :  { %v4781_v56 = vadd.f32 %v4923_v53, %v4773_v35 }
0x2c40   :  { %4783 = vst.msk [vmem:[#allocation8 + $0x8] sm:$0xff] %vm95_vm0, %v4781_v56 }
0x2c41   :  { %5638 = shalt.err (!%p5635_p0)
}
0x2c42   :  { %s5639_s26 = scalar_lea.hbm %s6474_s16, 256 }
0x2c43   :  { %p5640_p1 = scmp.ne.s32.totalorder %s6474_s16, %s5639_s26  ;;  %p5643_p2 = scmp.lt.u32.totalorder %s5639_s26, %s6474_s16 }
0x2c45   :  { %p5645_p3 = pnand %p5643_p2, %p5640_p1 }
0x2c47   :  { %5648 = shalt.err (!%p5645_p3)
}
0x2c48   :  { %s6483_s10 = smov 8   ;;  %s6484_s25 = smov 128  }
0x2c49   :  { %4795 = dma.vmem_to_hbm [thread:$0]  %s4790_s23, 256, %s6474_s16, [#allocation4], %s6484_s25, %s6484_s25, %s6483_s10  }
0x2c4a   :  { %5653 = dma.done.wait [#allocation4], 256  }
0x2c4b   :  { %5654 = vsyncadd [#allocation4], 4294967040 }
0x2c4c   :  { %4799 = vsyncpa [#allocation3], 1 }
0x2c4d   :  { %4800 = vsyncpa [#allocation6], 1 }
0x2c4e   :  { %4801 = vsyncpa [#allocation4], 1 }

</bundles_post_ra>
